<compile_context>
chip_gen: v7x
topology: tpu7x:2x2x1
jax: 0.10.0
libtpu: 0.0.40
codegen_flags: <defaults>
</compile_context>

<pallas_src>
import functools

import jax
import jax.numpy as jnp
from jax.experimental import pallas as pl
from jax.experimental.pallas import tpu as pltpu

EPS = 1e-5
OUT_PAD = 128                    # lane-dense combined (logits || value) width
TILE_N_MAX = 1024                # batch tile (per perf review)
VMEM_LIMIT_BYTES = 48 * 1024 * 1024

# Packed-bias layout: every segment starts on a 128-lane boundary.
_B1_OFF, _B2_OFF, _BH1_OFF, _BA2_OFF, _BV2_OFF, _B3_OFF = 0, 128, 256, 1280, 1792, 2304
_B_TOTAL = 2432


def _round_up(x, m):
    return ((x + m - 1) // m) * m


def use_bf16_epilogue():
    """bf16 bias/ReLU epilogues on v6e/v7x; f32 on v5-and-older (no bf16 VPU)."""
    try:
        kind = jax.devices()[0].device_kind.lower()
    except Exception:
        return False
    return not any(g in kind for g in ("v2", "v3", "v4", "v5"))


def net_kernel(x_ref, w1_ref, w2_ref, wh1_ref, wa2_ref, wv2_ref,
               w3a_ref, w3v_ref, b_ref, out_ref, *, bf16_epilogue):
    b1 = b_ref[:, _B1_OFF:_B1_OFF + 16]
    b2 = b_ref[:, _B2_OFF:_B2_OFF + 32]
    bh1 = b_ref[:, _BH1_OFF:_BH1_OFF + 1024]
    ba2 = b_ref[:, _BA2_OFF:_BA2_OFF + 512]
    bv2 = b_ref[:, _BV2_OFF:_BV2_OFF + 512]
    b3 = b_ref[:, _B3_OFF:_B3_OFF + OUT_PAD]

    ep_dtype = jnp.bfloat16 if bf16_epilogue else jnp.float32

    def dense(act_bf16, w_ref, bias):
        y = jnp.dot(act_bf16, w_ref[...], preferred_element_type=jnp.float32)
        y = y.astype(ep_dtype) + bias            # bias already in epilogue dtype
        return jnp.maximum(y, 0.0)

    x = x_ref[...].astype(jnp.bfloat16)
    h = dense(x, w1_ref, b1)                              # conv1 (BN folded) + ReLU
    h = dense(h.astype(jnp.bfloat16), w2_ref, b2)         # conv2 (BN folded) + ReLU
    hh = dense(h.astype(jnp.bfloat16), wh1_ref, bh1)      # fused [actor|critic] L1
    a = dense(hh[:, 0:512].astype(jnp.bfloat16), wa2_ref, ba2)     # actor L2
    v = dense(hh[:, 512:1024].astype(jnp.bfloat16), wv2_ref, bv2)  # critic L2

    # Head L3: split weights (no lane-axis concatenate), one (tile,128) store.
    s = (jnp.dot(a.astype(jnp.bfloat16), w3a_ref[...],
                 preferred_element_type=jnp.float32)
         + jnp.dot(v.astype(jnp.bfloat16), w3v_ref[...],
                   preferred_element_type=jnp.float32))
    out_ref[...] = (s + b3.astype(jnp.float32)).astype(out_ref.dtype)


def init_params(key, s_dim, a_dim):
    """Deterministic PyTorch-style init. Weights stored (in, out); vectors (1, out)."""
    keys = iter(jax.random.split(key, 32))

    def linear(fan_in, fan_out):
        bound = 1.0 / (fan_in ** 0.5)
        w = jax.random.uniform(next(keys), (fan_in, fan_out), jnp.float32, -bound, bound)
        b = jax.random.uniform(next(keys), (1, fan_out), jnp.float32, -bound, bound)
        return w, b

    def bn(c):
        g = jax.random.uniform(next(keys), (1, c), jnp.float32, 0.5, 1.5)
        be = jax.random.uniform(next(keys), (1, c), jnp.float32, -0.5, 0.5)
        rm = jax.random.uniform(next(keys), (1, c), jnp.float32, -0.5, 0.5)
        rv = jax.random.uniform(next(keys), (1, c), jnp.float32, 0.5, 1.5)
        return g, be, rm, rv

    p = {}
    p["w1"], p["b1"] = linear(s_dim, 16)           # Conv1d(s_dim, 16, k=1)
    p["g1"], p["be1"], p["rm1"], p["rv1"] = bn(16)
    p["w2"], p["b2"] = linear(16, 32)              # Conv1d(16, 32, k=1)
    p["g2"], p["be2"], p["rm2"], p["rv2"] = bn(32)
    p["wa1"], p["ba1"] = linear(32, 512)
    p["wa2"], p["ba2"] = linear(512, 512)
    p["wa3"], p["ba3"] = linear(512, a_dim)
    p["wv1"], p["bv1"] = linear(32, 512)
    p["wv2"], p["bv2"] = linear(512, 512)
    p["wv3"], p["bv3"] = linear(512, 1)
    return p


def pack_params(p, a_dim, *, bf16_epilogue):
    """Fold eval-mode BN into convs, fuse heads, pack biases, cast weights to bf16."""
    assert a_dim + 1 <= OUT_PAD

    scale1 = p["g1"] * jax.lax.rsqrt(p["rv1"] + EPS)
    w1f = p["w1"] * scale1
    b1f = (p["b1"] - p["rm1"]) * scale1 + p["be1"]
    scale2 = p["g2"] * jax.lax.rsqrt(p["rv2"] + EPS)
    w2f = p["w2"] * scale2
    b2f = (p["b2"] - p["rm2"]) * scale2 + p["be2"]

    wh1 = jnp.concatenate([p["wa1"], p["wv1"]], axis=1)          # (32, 1024)
    bh1 = jnp.concatenate([p["ba1"], p["bv1"]], axis=1)          # (1, 1024)

    # Split head-3 weights: two (512, 128) lane-dense slabs (no block-diag concat).
    w3a = jnp.zeros((512, OUT_PAD), jnp.float32).at[:, :a_dim].set(p["wa3"])
    w3v = jnp.zeros((512, OUT_PAD), jnp.float32).at[:, a_dim:a_dim + 1].set(p["wv3"])
    b3 = jnp.zeros((1, OUT_PAD), jnp.float32)
    b3 = b3.at[:, :a_dim].set(p["ba3"]).at[:, a_dim:a_dim + 1].set(p["bv3"])

    def pad128(v):
        return jnp.pad(v, ((0, 0), (0, 128 - v.shape[1])))

    b_packed = jnp.concatenate(
        [pad128(b1f), pad128(b2f), bh1, p["ba2"], p["bv2"], b3], axis=1)
    assert b_packed.shape == (1, _B_TOTAL)

    bias_dtype = jnp.bfloat16 if bf16_epilogue else jnp.float32
    bf16 = lambda t: t.astype(jnp.bfloat16)
    return {
        "w1": bf16(w1f), "w2": bf16(w2f), "wh1": bf16(wh1),
        "wa2": bf16(p["wa2"]), "wv2": bf16(p["wv2"]),
        "w3a": bf16(w3a), "w3v": bf16(w3v),
        "b": b_packed.astype(bias_dtype),
    }


def net_forward(x, packed, a_dim, *, bf16_epilogue):
    """x: (N, s_dim, L) in NCL layout. Returns (logits (N,a_dim), values (N,1)) f32."""
    N, s_dim, L = x.shape
    # Conv output length with k=1 and strides (5, 3); the flatten feeds
    # Linear(32, ...), so it must equal 1 -> only x[:, :, 0] reaches the heads.
    l_c1 = (L - 1) // 5 + 1
    l_c2 = (l_c1 - 1) // 3 + 1
    assert l_c2 == 1, "Linear(32, ...) after flatten requires conv output length 1"
    x0 = x[:, :, 0]

    n8 = max(8, _round_up(N, 8))
    if n8 <= 16:
        tile = n8                                           # single grid step
    else:
        # >= 2 grid steps so v7x megacore can shard the batch; cap at TILE_N_MAX.
        tile = min(TILE_N_MAX, _round_up((n8 + 1) // 2, 16))
    n_pad = _round_up(n8, tile)
    if n_pad != N:
        x0 = jnp.pad(x0, ((0, n_pad - N), (0, 0)))

    const2 = lambda i: (0, 0)   # weights stay VMEM-resident across the batch grid
    grid_spec = pltpu.PrefetchScalarGridSpec(
        num_scalar_prefetch=0,
        grid=(n_pad // tile,),
        in_specs=[
            pl.BlockSpec((tile, s_dim), lambda i: (i, 0)),
            pl.BlockSpec(packed["w1"].shape, const2),
            pl.BlockSpec(packed["w2"].shape, const2),
            pl.BlockSpec(packed["wh1"].shape, const2),
            pl.BlockSpec(packed["wa2"].shape, const2),
            pl.BlockSpec(packed["wv2"].shape, const2),
            pl.BlockSpec(packed["w3a"].shape, const2),
            pl.BlockSpec(packed["w3v"].shape, const2),
            pl.BlockSpec(packed["b"].shape, const2),
        ],
        out_specs=pl.BlockSpec((tile, OUT_PAD), lambda i: (i, 0)),
    )

    kernel = functools.partial(net_kernel, bf16_epilogue=bf16_epilogue)
    out = pl.pallas_call(
        kernel,
        out_shape=jax.ShapeDtypeStruct((n_pad, OUT_PAD), jnp.bfloat16),
        grid_spec=grid_spec,
        compiler_params=pltpu.CompilerParams(
            dimension_semantics=("parallel",),
            vmem_limit_bytes=VMEM_LIMIT_BYTES),
    )(x0, packed["w1"], packed["w2"], packed["wh1"], packed["wa2"],
      packed["wv2"], packed["w3a"], packed["w3v"], packed["b"])

    logits = out[:N, :a_dim].astype(jnp.float32)
    values = out[:N, a_dim:a_dim + 1].astype(jnp.float32)
    return logits, values


def net_forward_ref_packed(x, packed, a_dim, *, bf16_epilogue):
    """Pure-JAX mirror of the exact kernel math (bf16 weights/epilogue/output)."""
    ep_dtype = jnp.bfloat16 if bf16_epilogue else jnp.float32
    x0 = x[:, :, 0]
    b = packed["b"]
    b1 = b[:, _B1_OFF:_B1_OFF + 16]
    b2 = b[:, _B2_OFF:_B2_OFF + 32]
    bh1 = b[:, _BH1_OFF:_BH1_OFF + 1024]
    ba2 = b[:, _BA2_OFF:_BA2_OFF + 512]
    bv2 = b[:, _BV2_OFF:_BV2_OFF + 512]
    b3 = b[:, _B3_OFF:_B3_OFF + OUT_PAD]

    def dense(act, w, bias):
        y = jnp.dot(act.astype(jnp.bfloat16), w, preferred_element_type=jnp.float32)
        return jnp.maximum(y.astype(ep_dtype) + bias, 0.0)

    h = dense(x0, packed["w1"], b1)
    h = dense(h, packed["w2"], b2)
    hh = dense(h, packed["wh1"], bh1)
    a = dense(hh[:, :512], packed["wa2"], ba2)
    v = dense(hh[:, 512:], packed["wv2"], bv2)
    s = (jnp.dot(a.astype(jnp.bfloat16), packed["w3a"], preferred_element_type=jnp.float32)
         + jnp.dot(v.astype(jnp.bfloat16), packed["w3v"], preferred_element_type=jnp.float32))
    out = (s + b3.astype(jnp.float32)).astype(jnp.bfloat16)
    return (out[:, :a_dim].astype(jnp.float32),
            out[:, a_dim:a_dim + 1].astype(jnp.float32))


def net_forward_ref_f32(x, p):
    """Full-precision reference of the original (unfused, unfolded) module."""
    h = x[:, :, 0]
    h = h @ p["w1"] + p["b1"]
    h = (h - p["rm1"]) * (p["g1"] / jnp.sqrt(p["rv1"] + EPS)) + p["be1"]
    h = jnp.maximum(h, 0.0)
    h = h @ p["w2"] + p["b2"]
    h = (h - p["rm2"]) * (p["g2"] / jnp.sqrt(p["rv2"] + EPS)) + p["be2"]
    h = jnp.maximum(h, 0.0)
    a = jnp.maximum(h @ p["wa1"] + p["ba1"], 0.0)
    a = jnp.maximum(a @ p["wa2"] + p["ba2"], 0.0)
    logits = a @ p["wa3"] + p["ba3"]
    v = jnp.maximum(h @ p["wv1"] + p["bv1"], 0.0)
    v = jnp.maximum(v @ p["wv2"] + p["bv2"], 0.0)
    values = v @ p["wv3"] + p["bv3"]
    return logits, values


if __name__ == "__main__":
    key = jax.random.PRNGKey(0)
    k_x, k_p, k_x2 = jax.random.split(key, 3)

    N, S_DIM, L, A_DIM = 2, 4, 5, 8          # x: (batch, s_dim, seq_len) NCL
    x = jax.random.normal(k_x, (N, S_DIM, L), jnp.float32)
    params = init_params(k_p, S_DIM, A_DIM)

    bf16_ep = use_bf16_epilogue()
    packed = pack_params(params, A_DIM, bf16_epilogue=bf16_ep)

    logits, values = net_forward(x, packed, A_DIM, bf16_epilogue=bf16_ep)
    jax.block_until_ready((logits, values))
    assert logits.shape == (N, A_DIM) and values.shape == (N, 1)

    # Strict check against a pure-JAX mirror of the exact kernel math.
    lr_b, vr_b = net_forward_ref_packed(x, packed, A_DIM, bf16_epilogue=bf16_ep)
    assert jnp.allclose(logits, lr_b, atol=1e-2, rtol=1e-2)
    assert jnp.allclose(values, vr_b, atol=1e-2, rtol=1e-2)

    # Loose check against the original f32 module math (bf16 quantization noise).
    lr_f, vr_f = net_forward_ref_f32(x, params)
    assert jnp.allclose(logits, lr_f, atol=5e-2, rtol=5e-2)
    assert jnp.allclose(values, vr_f, atol=5e-2, rtol=5e-2)

    # Also exercise the multi-step (>= 2 grid steps) padded-batch path.
    N2 = 24
    x2 = jax.random.normal(k_x2, (N2, S_DIM, L), jnp.float32)
    logits2, values2 = net_forward(x2, packed, A_DIM, bf16_epilogue=bf16_ep)
    jax.block_until_ready((logits2, values2))
    lr2, vr2 = net_forward_ref_packed(x2, packed, A_DIM, bf16_epilogue=bf16_ep)
    assert logits2.shape == (N2, A_DIM) and values2.shape == (N2, 1)
    assert jnp.allclose(logits2, lr2, atol=1e-2, rtol=1e-2)
    assert jnp.allclose(values2, vr2, atol=1e-2, rtol=1e-2)

    print("KERNEL_OK")
</pallas_src>

<mosaic_0001>
module attributes {stable_mosaic.version = 11 : i64} {
  func.func @net_kernel(%arg0: i32, %arg1: memref<8x4xf32, #tpu.memory_space<vmem>>, %arg2: memref<4x16xbf16, #tpu.memory_space<vmem>>, %arg3: memref<16x32xbf16, #tpu.memory_space<vmem>>, %arg4: memref<32x1024xbf16, #tpu.memory_space<vmem>>, %arg5: memref<512x512xbf16, #tpu.memory_space<vmem>>, %arg6: memref<512x512xbf16, #tpu.memory_space<vmem>>, %arg7: memref<512x128xbf16, #tpu.memory_space<vmem>>, %arg8: memref<512x128xbf16, #tpu.memory_space<vmem>>, %arg9: memref<1x2432xbf16, #tpu.memory_space<vmem>>, %arg10: memref<8x128xbf16, #tpu.memory_space<vmem>>) attributes {dimension_semantics = [#tpu.dimension_semantics<parallel>], iteration_bounds = array<i64: 1>, scalar_prefetch = 0 : i64, scratch_operands = 0 : i64, tpu.core_type = #tpu.core_type<tc>, window_params = [{transform_indices = @transform_0, window_bounds = array<i64: 8, 4>}, {pipeline_mode = #tpu.pipeline_mode<synchronous>, transform_indices = @transform_1, window_bounds = array<i64: 4, 16>}, {pipeline_mode = #tpu.pipeline_mode<synchronous>, transform_indices = @transform_2, window_bounds = array<i64: 16, 32>}, {pipeline_mode = #tpu.pipeline_mode<synchronous>, transform_indices = @transform_3, window_bounds = array<i64: 32, 1024>}, {pipeline_mode = #tpu.pipeline_mode<synchronous>, transform_indices = @transform_4, window_bounds = array<i64: 512, 512>}, {pipeline_mode = #tpu.pipeline_mode<synchronous>, transform_indices = @transform_5, window_bounds = array<i64: 512, 512>}, {pipeline_mode = #tpu.pipeline_mode<synchronous>, transform_indices = @transform_6, window_bounds = array<i64: 512, 128>}, {pipeline_mode = #tpu.pipeline_mode<synchronous>, transform_indices = @transform_7, window_bounds = array<i64: 512, 128>}, {pipeline_mode = #tpu.pipeline_mode<synchronous>, transform_indices = @transform_8, window_bounds = array<i64: 1, 2432>}, {transform_indices = @transform_9, window_bounds = array<i64: 8, 128>}]} {
    %c0 = arith.constant 0 : index
    %c0_0 = arith.constant 0 : index
    %0 = vector.load %arg9[%c0, %c0_0] : memref<1x2432xbf16, #tpu.memory_space<vmem>>, vector<1x16xbf16>
    %c0_1 = arith.constant 0 : index
    %c128 = arith.constant 128 : index
    %1 = vector.load %arg9[%c0_1, %c128] : memref<1x2432xbf16, #tpu.memory_space<vmem>>, vector<1x32xbf16>
    %c0_2 = arith.constant 0 : index
    %c256 = arith.constant 256 : index
    %2 = vector.load %arg9[%c0_2, %c256] : memref<1x2432xbf16, #tpu.memory_space<vmem>>, vector<1x1024xbf16>
    %c0_3 = arith.constant 0 : index
    %c1280 = arith.constant 1280 : index
    %3 = vector.load %arg9[%c0_3, %c1280] : memref<1x2432xbf16, #tpu.memory_space<vmem>>, vector<1x512xbf16>
    %c0_4 = arith.constant 0 : index
    %c1792 = arith.constant 1792 : index
    %4 = vector.load %arg9[%c0_4, %c1792] : memref<1x2432xbf16, #tpu.memory_space<vmem>>, vector<1x512xbf16>
    %c0_5 = arith.constant 0 : index
    %c2304 = arith.constant 2304 : index
    %5 = vector.load %arg9[%c0_5, %c2304] : memref<1x2432xbf16, #tpu.memory_space<vmem>>, vector<1x128xbf16>
    %c0_6 = arith.constant 0 : index
    %c0_7 = arith.constant 0 : index
    %6 = vector.load %arg1[%c0_6, %c0_7] : memref<8x4xf32, #tpu.memory_space<vmem>>, vector<8x4xf32>
    %7 = arith.truncf %6 : vector<8x4xf32> to vector<8x4xbf16>
    %c0_8 = arith.constant 0 : index
    %c0_9 = arith.constant 0 : index
    %8 = vector.load %arg2[%c0_8, %c0_9] : memref<4x16xbf16, #tpu.memory_space<vmem>>, vector<4x16xbf16>
    %cst = arith.constant dense<0.000000e+00> : vector<8x16xf32>
    %9 = tpu.matmul %7, %8, %cst {dimension_numbers = #tpu.dot_dimension_numbers<[1], [0], [0], [1], [0, 0, 1, 1], [], []>} : vector<8x4xbf16>, vector<4x16xbf16>, vector<8x16xf32> -> vector<8x16xf32>
    %10 = arith.truncf %9 : vector<8x16xf32> to vector<8x16xbf16>
    %11 = vector.broadcast %0 : vector<1x16xbf16> to vector<8x16xbf16>
    %12 = arith.addf %10, %11 : vector<8x16xbf16>
    %cst_10 = arith.constant 0.000000e+00 : bf16
    %13 = vector.broadcast %cst_10 : bf16 to vector<8x16xbf16>
    %14 = arith.maximumf %12, %13 : vector<8x16xbf16>
    %c0_11 = arith.constant 0 : index
    %c0_12 = arith.constant 0 : index
    %15 = vector.load %arg3[%c0_11, %c0_12] : memref<16x32xbf16, #tpu.memory_space<vmem>>, vector<16x32xbf16>
    %cst_13 = arith.constant dense<0.000000e+00> : vector<8x32xf32>
    %16 = tpu.matmul %14, %15, %cst_13 {dimension_numbers = #tpu.dot_dimension_numbers<[1], [0], [0], [1], [0, 0, 1, 1], [], []>} : vector<8x16xbf16>, vector<16x32xbf16>, vector<8x32xf32> -> vector<8x32xf32>
    %17 = arith.truncf %16 : vector<8x32xf32> to vector<8x32xbf16>
    %18 = vector.broadcast %1 : vector<1x32xbf16> to vector<8x32xbf16>
    %19 = arith.addf %17, %18 : vector<8x32xbf16>
    %cst_14 = arith.constant 0.000000e+00 : bf16
    %20 = vector.broadcast %cst_14 : bf16 to vector<8x32xbf16>
    %21 = arith.maximumf %19, %20 : vector<8x32xbf16>
    %c0_15 = arith.constant 0 : index
    %c0_16 = arith.constant 0 : index
    %22 = vector.load %arg4[%c0_15, %c0_16] : memref<32x1024xbf16, #tpu.memory_space<vmem>>, vector<32x1024xbf16>
    %cst_17 = arith.constant dense<0.000000e+00> : vector<8x1024xf32>
    %23 = tpu.matmul %21, %22, %cst_17 {dimension_numbers = #tpu.dot_dimension_numbers<[1], [0], [0], [1], [0, 0, 1, 1], [], []>} : vector<8x32xbf16>, vector<32x1024xbf16>, vector<8x1024xf32> -> vector<8x1024xf32>
    %24 = arith.truncf %23 : vector<8x1024xf32> to vector<8x1024xbf16>
    %25 = vector.broadcast %2 : vector<1x1024xbf16> to vector<8x1024xbf16>
    %26 = arith.addf %24, %25 : vector<8x1024xbf16>
    %cst_18 = arith.constant 0.000000e+00 : bf16
    %27 = vector.broadcast %cst_18 : bf16 to vector<8x1024xbf16>
    %28 = arith.maximumf %26, %27 : vector<8x1024xbf16>
    %29 = vector.extract_strided_slice %28 {offsets = [0, 0], sizes = [8, 512], strides = [1, 1]} : vector<8x1024xbf16> to vector<8x512xbf16>
    %c0_19 = arith.constant 0 : index
    %c0_20 = arith.constant 0 : index
    %30 = vector.load %arg5[%c0_19, %c0_20] : memref<512x512xbf16, #tpu.memory_space<vmem>>, vector<512x512xbf16>
    %cst_21 = arith.constant dense<0.000000e+00> : vector<8x512xf32>
    %31 = tpu.matmul %29, %30, %cst_21 {dimension_numbers = #tpu.dot_dimension_numbers<[1], [0], [0], [1], [0, 0, 1, 1], [], []>} : vector<8x512xbf16>, vector<512x512xbf16>, vector<8x512xf32> -> vector<8x512xf32>
    %32 = arith.truncf %31 : vector<8x512xf32> to vector<8x512xbf16>
    %33 = vector.broadcast %3 : vector<1x512xbf16> to vector<8x512xbf16>
    %34 = arith.addf %32, %33 : vector<8x512xbf16>
    %cst_22 = arith.constant 0.000000e+00 : bf16
    %35 = vector.broadcast %cst_22 : bf16 to vector<8x512xbf16>
    %36 = arith.maximumf %34, %35 : vector<8x512xbf16>
    %37 = vector.extract_strided_slice %28 {offsets = [0, 512], sizes = [8, 512], strides = [1, 1]} : vector<8x1024xbf16> to vector<8x512xbf16>
    %c0_23 = arith.constant 0 : index
    %c0_24 = arith.constant 0 : index
    %38 = vector.load %arg6[%c0_23, %c0_24] : memref<512x512xbf16, #tpu.memory_space<vmem>>, vector<512x512xbf16>
    %cst_25 = arith.constant dense<0.000000e+00> : vector<8x512xf32>
    %39 = tpu.matmul %37, %38, %cst_25 {dimension_numbers = #tpu.dot_dimension_numbers<[1], [0], [0], [1], [0, 0, 1, 1], [], []>} : vector<8x512xbf16>, vector<512x512xbf16>, vector<8x512xf32> -> vector<8x512xf32>
    %40 = arith.truncf %39 : vector<8x512xf32> to vector<8x512xbf16>
    %41 = vector.broadcast %4 : vector<1x512xbf16> to vector<8x512xbf16>
    %42 = arith.addf %40, %41 : vector<8x512xbf16>
    %cst_26 = arith.constant 0.000000e+00 : bf16
    %43 = vector.broadcast %cst_26 : bf16 to vector<8x512xbf16>
    %44 = arith.maximumf %42, %43 : vector<8x512xbf16>
    %c0_27 = arith.constant 0 : index
    %c0_28 = arith.constant 0 : index
    %45 = vector.load %arg7[%c0_27, %c0_28] : memref<512x128xbf16, #tpu.memory_space<vmem>>, vector<512x128xbf16>
    %cst_29 = arith.constant dense<0.000000e+00> : vector<8x128xf32>
    %46 = tpu.matmul %36, %45, %cst_29 {dimension_numbers = #tpu.dot_dimension_numbers<[1], [0], [0], [1], [0, 0, 1, 1], [], []>} : vector<8x512xbf16>, vector<512x128xbf16>, vector<8x128xf32> -> vector<8x128xf32>
    %c0_30 = arith.constant 0 : index
    %c0_31 = arith.constant 0 : index
    %47 = vector.load %arg8[%c0_30, %c0_31] : memref<512x128xbf16, #tpu.memory_space<vmem>>, vector<512x128xbf16>
    %cst_32 = arith.constant dense<0.000000e+00> : vector<8x128xf32>
    %48 = tpu.matmul %44, %47, %cst_32 {dimension_numbers = #tpu.dot_dimension_numbers<[1], [0], [0], [1], [0, 0, 1, 1], [], []>} : vector<8x512xbf16>, vector<512x128xbf16>, vector<8x128xf32> -> vector<8x128xf32>
    %49 = arith.addf %46, %48 : vector<8x128xf32>
    %50 = arith.extf %5 : vector<1x128xbf16> to vector<1x128xf32>
    %51 = vector.broadcast %50 : vector<1x128xf32> to vector<8x128xf32>
    %52 = arith.addf %49, %51 : vector<8x128xf32>
    %53 = arith.truncf %52 : vector<8x128xf32> to vector<8x128xbf16>
    %c0_33 = arith.constant 0 : index
    %c0_34 = arith.constant 0 : index
    %54 = vector.load %arg10[%c0_33, %c0_34] : memref<8x128xbf16, #tpu.memory_space<vmem>>, vector<8x128xbf16>
    tpu.vector_store %arg10[%c0_33, %c0_34], %53 {strides = array<i32>} : memref<8x128xbf16, #tpu.memory_space<vmem>>, vector<8x128xbf16>,
    return
  }
  func.func @transform_0(%arg0: i32) -> (i32, i32) {
    %c0_i32 = arith.constant 0 : i32
    %c0_i32_0 = arith.constant 0 : i32
    return %arg0, %c0_i32 : i32, i32
  }
  func.func @transform_1(%arg0: i32) -> (i32, i32) {
    %c0_i32 = arith.constant 0 : i32
    %c0_i32_0 = arith.constant 0 : i32
    %c0_i32_1 = arith.constant 0 : i32
    return %c0_i32, %c0_i32_0 : i32, i32
  }
  func.func @transform_2(%arg0: i32) -> (i32, i32) {
    %c0_i32 = arith.constant 0 : i32
    %c0_i32_0 = arith.constant 0 : i32
    %c0_i32_1 = arith.constant 0 : i32
    return %c0_i32, %c0_i32_0 : i32, i32
  }
  func.func @transform_3(%arg0: i32) -> (i32, i32) {
    %c0_i32 = arith.constant 0 : i32
    %c0_i32_0 = arith.constant 0 : i32
    %c0_i32_1 = arith.constant 0 : i32
    return %c0_i32, %c0_i32_0 : i32, i32
  }
  func.func @transform_4(%arg0: i32) -> (i32, i32) {
    %c0_i32 = arith.constant 0 : i32
    %c0_i32_0 = arith.constant 0 : i32
    %c0_i32_1 = arith.constant 0 : i32
    return %c0_i32, %c0_i32_0 : i32, i32
  }
  func.func @transform_5(%arg0: i32) -> (i32, i32) {
    %c0_i32 = arith.constant 0 : i32
    %c0_i32_0 = arith.constant 0 : i32
    %c0_i32_1 = arith.constant 0 : i32
    return %c0_i32, %c0_i32_0 : i32, i32
  }
  func.func @transform_6(%arg0: i32) -> (i32, i32) {
    %c0_i32 = arith.constant 0 : i32
    %c0_i32_0 = arith.constant 0 : i32
    %c0_i32_1 = arith.constant 0 : i32
    return %c0_i32, %c0_i32_0 : i32, i32
  }
  func.func @transform_7(%arg0: i32) -> (i32, i32) {
    %c0_i32 = arith.constant 0 : i32
    %c0_i32_0 = arith.constant 0 : i32
    %c0_i32_1 = arith.constant 0 : i32
    return %c0_i32, %c0_i32_0 : i32, i32
  }
  func.func @transform_8(%arg0: i32) -> (i32, i32) {
    %c0_i32 = arith.constant 0 : i32
    %c0_i32_0 = arith.constant 0 : i32
    %c0_i32_1 = arith.constant 0 : i32
    return %c0_i32, %c0_i32_0 : i32, i32
  }
  func.func @transform_9(%arg0: i32) -> (i32, i32) {
    %c0_i32 = arith.constant 0 : i32
    %c0_i32_0 = arith.constant 0 : i32
    return %arg0, %c0_i32 : i32, i32
  }
}

</mosaic_0001>

<bundles_post_ra>
// kernel: tpu_custom_call.1
= control target key start
LH: loop header
LB: loop body
LE: loop exit
PB: predicated region body
PF: predicated region fallthrough
CT: control target
= control target key end

     0   :  { %14 = vsyncpa [#allocation3], 0  ;;  %s4670_s0 = inlined_call_operand.vmem [shape: f32[8,4], index: 0, kind: input, shape index: {}]   ;;  %s4671_s1 = inlined_call_operand.vmem [shape: bf16[4,16], index: 1, kind: input, shape index: {}]   ;;  %s4672_s2 = inlined_call_operand.vmem [shape: bf16[16,32], index: 2, kind: input, shape index: {}]   ;;  %s4673_s3 = inlined_call_operand.hbm [shape: bf16[32,1024], index: 3, kind: input, shape index: {}]   ;;  %s4674_s4 = inlined_call_operand.hbm [shape: bf16[512,512], index: 4, kind: input, shape index: {}]   ;;  %s4675_s5 = inlined_call_operand.hbm [shape: bf16[512,512], index: 5, kind: input, shape index: {}]   ;;  %s4676_s6 = inlined_call_operand.hbm [shape: bf16[512,128], index: 6, kind: input, shape index: {}]   ;;  %s4677_s7 = inlined_call_operand.hbm [shape: bf16[512,128], index: 7, kind: input, shape index: {}]   ;;  %s4678_s8 = inlined_call_operand.vmem [shape: bf16[1,2432], index: 8, kind: input, shape index: {}]   ;;  %s4679_s9 = inlined_call_operand.hbm [shape: bf16[8,128], index: 9, kind: output, shape index: {}]  }
   0x1   :  { %15 = vsyncpa [#allocation6], 0 }
   0x2   :  { %16 = vsyncpa [#allocation9], 0 }
   0x3   :  { %17 = vsyncpa [#allocation4], 0  ;;  %s4387_s30 = smov [#allocation5]   ;;  %s4247_s13 = scalar_lea.hbm %s4674_s4, 16384 }
   0x4   :  { %s41_s10 = sshll.u32 %s4387_s30, 4  ;;  %p4248_p0 = scmp.ne.s32.totalorder %s4674_s4, %s4247_s13  ;;  %s42_s10 = int_to_ptr.vmem [resolvable:$true] %s41_s10 }
   0x5   :  { %p4251_p1 = scmp.lt.u32.totalorder %s4247_s13, %s4674_s4 }
   0x7   :  { %p4253_p2 = pnand %p4251_p1, %p4248_p0 }
   0x9   :  { %4256 = shalt.err (!%p4253_p2)
}
   0xa   :  { %s4257_s18 = scalar_lea.vmem %s42_s10, 16384  ;;  %p4262_p4 = scmp.lt.s32.totalorder %s42_s10, %s42_s10 }
   0xb   :  { %p4258_p3 = scmp.ne.s32.totalorder %s42_s10, %s4257_s18  ;;  %p4263_p5 = scmp.lt.s32.totalorder %s4257_s18, %s4257_s18 }
   0xd   :  { %p4264_p6 = por %p4263_p5, %p4262_p4 }
   0xf   :  { %p4265_p7 = pnand %p4264_p6, %p4258_p3 }
  0x11   :  { %4268 = shalt.err (!%p4265_p7)
}
  0x12   :  { %s4388_s19 = smov 256   ;;  %s4389_s20 = smov 16  }
  0x13   :  { %47 = dma.hbm_to_vmem [thread:$0]  %s4674_s4, 16384, %s42_s10, [#allocation6], %s4388_s19, %s4388_s19, %s4389_s20  }
  0x14   :  { %s4390_s23 = smov [#allocation8]   ;;  %s4269_s27 = scalar_lea.hbm %s4676_s6, 4096 }
  0x15   :  { %s65_s24 = sshll.u32 %s4390_s23, 4  ;;  %p4270_p8 = scmp.ne.s32.totalorder %s4676_s6, %s4269_s27  ;;  %s66_s24 = int_to_ptr.vmem [resolvable:$true] %s65_s24 }
  0x16   :  { %p4273_p9 = scmp.lt.u32.totalorder %s4269_s27, %s4676_s6 }
  0x18   :  { %p4275_p10 = pnand %p4273_p9, %p4270_p8 }
  0x1a   :  { %4278 = shalt.err (!%p4275_p10)
}
  0x1b   :  { %s4279_s12 = scalar_lea.vmem %s66_s24, 4096  ;;  %p4284_p12 = scmp.lt.s32.totalorder %s66_s24, %s66_s24 }
  0x1c   :  { %p4280_p11 = scmp.ne.s32.totalorder %s66_s24, %s4279_s12  ;;  %p4285_p13 = scmp.lt.s32.totalorder %s4279_s12, %s4279_s12 }
  0x1e   :  { %p4286_p0 = por %p4285_p13, %p4284_p12 }
  0x20   :  { %p4287_p1 = pnand %p4286_p0, %p4280_p11 }
  0x22   :  { %4290 = shalt.err (!%p4287_p1)
}
  0x23   :  { %s4391_s4 = smov 64   ;;  %s4392_s10 = smov 4  }
  0x24   :  { %71 = dma.hbm_to_vmem [thread:$0]  %s4676_s6, 4096, %s66_s24, [#allocation9], %s4391_s4, %s4391_s4, %s4392_s10  }
  0x25   :  { %s4393_s15 = smov [#allocation2]   ;;  %s4291_s21 = scalar_lea.hbm %s4673_s3, 2048 }
  0x26   :  { %s29_s16 = sshll.u32 %s4393_s15, 4  ;;  %p4292_p2 = scmp.ne.s32.totalorder %s4673_s3, %s4291_s21  ;;  %s30_s16 = int_to_ptr.vmem [resolvable:$true] %s29_s16 }
  0x27   :  { %p4295_p3 = scmp.lt.u32.totalorder %s4291_s21, %s4673_s3 }
  0x29   :  { %p4297_p4 = pnand %p4295_p3, %p4292_p2 }
  0x2b   :  { %4300 = shalt.err (!%p4297_p4)
}
  0x2c   :  { %s4301_s27 = scalar_lea.vmem %s30_s16, 2048  ;;  %p4306_p6 = scmp.lt.s32.totalorder %s30_s16, %s30_s16 }
  0x2d   :  { %p4302_p5 = scmp.ne.s32.totalorder %s30_s16, %s4301_s27  ;;  %p4307_p7 = scmp.lt.s32.totalorder %s4301_s27, %s4301_s27 }
  0x2f   :  { %p4308_p8 = por %p4307_p7, %p4306_p6 }
  0x31   :  { %p4309_p9 = pnand %p4308_p8, %p4302_p5 }
  0x33   :  { %4312 = shalt.err (!%p4309_p9)
}
  0x34   :  { %s4394_s6 = smov 512   ;;  %s4395_s24 = smov 32  }
  0x35   :  { %35 = dma.hbm_to_vmem [thread:$0]  %s4673_s3, 2048, %s30_s16, [#allocation3], %s4394_s6, %s4394_s6, %s4395_s24  }
  0x36   :  { %s4396_s30 = smov [#allocation7]   ;;  %s4397_s12 = smov [#allocation10]  }
  0x37   :  { %s53_s11 = sshll.u32 %s4396_s30, 4  ;;  %s77_s13 = sshll.u32 %s4397_s12, 4  ;;  %s54_s11 = int_to_ptr.vmem [resolvable:$true] %s53_s11  ;;  %s78_s13 = int_to_ptr.vmem [resolvable:$true] %s77_s13 }
  0x38   :  { %s4313_s17 = scalar_lea.hbm %s4675_s5, 16384 }
  0x39   :  { %p4314_p10 = scmp.ne.s32.totalorder %s4675_s5, %s4313_s17  ;;  %p4317_p11 = scmp.lt.u32.totalorder %s4313_s17, %s4675_s5 }
  0x3b   :  { %p4319_p12 = pnand %p4317_p11, %p4314_p10 }
  0x3d   :  { %4322 = shalt.err (!%p4319_p12)
}
  0x3e   :  { %s4323_s3 = scalar_lea.vmem %s54_s11, 16384  ;;  %p4328_p0 = scmp.lt.s32.totalorder %s54_s11, %s54_s11 }
  0x3f   :  { %p4324_p13 = scmp.ne.s32.totalorder %s54_s11, %s4323_s3  ;;  %p4329_p1 = scmp.lt.s32.totalorder %s4323_s3, %s4323_s3 }
  0x41   :  { %p4330_p2 = por %p4329_p1, %p4328_p0 }
  0x43   :  { %p4331_p3 = pnand %p4330_p2, %p4324_p13 }
  0x45   :  { %4334 = shalt.err (!%p4331_p3)
}
  0x46   :  { %59 = dma.hbm_to_vmem [thread:$0]  %s4675_s5, 16384, %s54_s11, [#allocation6], %s4388_s19, %s4388_s19, %s4389_s20  }
  0x47   :  { %s4335_s6 = scalar_lea.hbm %s4677_s7, 4096 }
  0x48   :  { %p4336_p4 = scmp.ne.s32.totalorder %s4677_s7, %s4335_s6  ;;  %p4339_p5 = scmp.lt.u32.totalorder %s4335_s6, %s4677_s7 }
  0x4a   :  { %p4341_p6 = pnand %p4339_p5, %p4336_p4 }
  0x4c   :  { %4344 = shalt.err (!%p4341_p6)
}
  0x4d   :  { %s4345_s12 = scalar_lea.vmem %s78_s13, 4096  ;;  %p4350_p8 = scmp.lt.s32.totalorder %s78_s13, %s78_s13 }
  0x4e   :  { %p4346_p7 = scmp.ne.s32.totalorder %s78_s13, %s4345_s12  ;;  %p4351_p9 = scmp.lt.s32.totalorder %s4345_s12, %s4345_s12 }
  0x50   :  { %p4352_p10 = por %p4351_p9, %p4350_p8 }
  0x52   :  { %p4353_p11 = pnand %p4352_p10, %p4346_p7 }
  0x54   :  { %4356 = shalt.err (!%p4353_p11)
}
  0x55   :  { %83 = dma.hbm_to_vmem [thread:$0]  %s4677_s7, 4096, %s78_s13, [#allocation9], %s4391_s4, %s4391_s4, %s4392_s10  }
  0x56   :  { %4379 = dma.done.wait [#allocation3], 2048  }
  0x57   :  { %4380 = vsyncadd [#allocation3], 4294965248 }
  0x58   :  { %4381 = dma.done.wait [#allocation6], 32768  }
  0x59   :  { %4382 = vsyncadd [#allocation6], 4294934528 }
  0x5a   :  { %4383 = dma.done.wait [#allocation9], 8192  }
  0x5b   :  { %4384 = vsyncadd [#allocation9], 4294959104  ;;  %v4398_v0 = vmov 0.0   ;;  %vm4399_vm0 = vmmov 0   ;;  %vm115_vm1 = vcmask 1041408   ;;  %v108_v2 = vld [vmem:[%s4670_s0] sm:$0xff]  ;;  %v163_v15 = vlaneseq }
  0x5c   :  { %3753 = vmatprep.subr.bf16.mxu0 %v4398_v0  ;;  %3755 = vmatprep.mubr.msk.bf16.mxu0 %vm4399_vm0, %v4398_v0  ;;  %v110_v1 = vld [vmem:[%s4671_s1] sm:$0x3]  ;;  %v109_v4 = vpack.c.bf16 %v108_v2, %v108_v2  ;;  %vm111_vm2 = vcmask 31744   ;;  %v4400_v6 = vmov 0   ;;  %v231_v7 = vld [vmem:[#allocation2] sm:$0xff]  ;;  %v232_v9 = vld [vmem:[#allocation2 + $0x8] sm:$0xff] }
  0x5d   :  { %3759 = vmatprep.subr.bf16.mxu1 %v4398_v0  ;;  %3761 = vmatprep.mubr.msk.bf16.mxu1 %vm4399_vm0, %v4398_v0  ;;  %v117_v3 = vsel %vm115_vm1, %v110_v1, 0  ;;  %v3797_v5 = vld [vmem:[%s4672_s2] sm:$0xff]   ;;  %v235_v8 = vld [vmem:[#allocation2 + $0x20] sm:$0xff]  ;;  %v236_v12 = vld [vmem:[#allocation2 + $0x28] sm:$0xff]  ;;  %v4535_v16 = vshrl.u32 %v163_v15, 7  ;;  %vm177_vm3 = vcmask 130048  }
  0x5e   :  { %3754 = vmatpush3.bf16.msra.mxu0 %v117_v3  ;;  %3760 = vmatpush3.bf16.msra.mxu1 %v3797_v5  ;;  %v3319_v10 = vcombine.low %v231_v7, %v235_v8  ;;  %v3320_v11 = vcombine.high %v231_v7, %v235_v8  ;;  %v3321_v13 = vcombine.low %v232_v9, %v236_v12  ;;  %v102_v17 = vld [vmem:[%s4678_s8] sm:$0x1]  ;;  %v239_v28 = vld [vmem:[#allocation2 + $0x40] sm:$0xff]  ;;  %v240_v30 = vld [vmem:[#allocation2 + $0x48] sm:$0xff]  ;;  %vm327_vm4 = vcmask 261120   ;;  %s4402_s25 = smov [#allocation11]  }
  0x5f   :  { %v3322_v14 = vcombine.high %v232_v9, %v236_v12  ;;  %v161_v18 = vpack.i.b16 %v102_v17, %v102_v17  ;;  %v4541_v19 = vsub.s32 0, %v4535_v16  ;;  %v243_v29 = vld [vmem:[#allocation2 + $0x60] sm:$0xff]  ;;  %v244_v32 = vld [vmem:[#allocation2 + $0x68] sm:$0xff]  ;;  %v233_v36 = vld [vmem:[#allocation2 + $0x10] sm:$0xff]  ;;  %s3305_s26 = sshll.u32 %s4402_s25, 4  ;;  %s3306_s26 = int_to_ptr.vmem [resolvable:$true] %s3305_s26 }
  0x60   :  { %331 = vmatprep.subr.bf16.mxu0 %v3320_v11  ;;  %v3328_v31 = vcombine.high %v239_v28, %v243_v29  ;;  %v3327_v33 = vcombine.low %v239_v28, %v243_v29  ;;  %v3329_v34 = vcombine.low %v240_v30, %v244_v32  ;;  %v3330_v35 = vcombine.high %v240_v30, %v244_v32  ;;  %v237_v37 = vld [vmem:[#allocation2 + $0x30] sm:$0xff]  ;;  %v234_v38 = vld [vmem:[#allocation2 + $0x18] sm:$0xff]  ;;  %p4362_p13 = scmp.lt.s32.totalorder %s3306_s26, %s3306_s26 }
  0x61   :  { %3756 = vmatmul.mubr.msk.bf16.vlgmr.msra.gmra.mrb[0].mxu0 %vm111_vm2, %v109_v4  ;;  %372 = vmatprep.subr.bf16.mxu1 %v3322_v14  ;;  %v166_v20 = vrot.slane %v161_v18, %v4541_v19  ;;  %v3324_v39 = vcombine.high %v233_v36, %v237_v37  ;;  %v238_v40 = vld [vmem:[#allocation2 + $0x38] sm:$0xff]  ;;  %v3323_v41 = vcombine.low %v233_v36, %v237_v37  ;;  %v241_v50 = vld [vmem:[#allocation2 + $0x50] sm:$0xff] }
  0x62   :  { %363 = vmatprep.mubr.bf16.mxu0 %v4400_v6  ;;  %332 = vmatpush1.bf16.msra.mxu0 %v3319_v10  ;;  %v3325_v42 = vcombine.low %v234_v38, %v238_v40  ;;  %v3326_v43 = vcombine.high %v234_v38, %v238_v40  ;;  %v103_v44 = vld [vmem:[%s4678_s8 + $0x1] sm:$0x1]  ;;  %v245_v52 = vld [vmem:[#allocation2 + $0x70] sm:$0xff]  ;;  %v3803_v63 = vld [vmem:[#allocation5 + $0xc] ss:$16 sps:$4 sm:$0xff]  }
  0x63   :  { %333 = vmatprep.subr.bf16.mxu0 %v3328_v31  ;;  %v223_v45 = vpack.i.b16 %v103_v44, %v103_v44  ;;  %v242_v53 = vld [vmem:[#allocation2 + $0x58] sm:$0xff]  ;;  %v3332_v58 = vcombine.high %v241_v50, %v245_v52  ;;  %v3331_v60 = vcombine.low %v241_v50, %v245_v52  ;;  %v3800_v62 = vld [vmem:[#allocation5 + $0x4] ss:$16 sps:$4 sm:$0xff]   ;;  %v3798_v0 = vld [vmem:[#allocation5] ss:$16 sps:$4 sm:$0xff]  }
  0x64   :  { %v246_v54 = vld [vmem:[#allocation2 + $0x78] sm:$0xff]  ;;  %v3806_v2 = vld [vmem:[#allocation5 + $0x24] ss:$16 sps:$4 sm:$0xff]   ;;  %v3804_v4 = vld [vmem:[#allocation5 + $0x20] ss:$16 sps:$4 sm:$0xff]  }
  0x65   :  { %v228_v46 = vrot.slane %v223_v45, %v4541_v19  ;;  %v3334_v59 = vcombine.high %v242_v53, %v246_v54  ;;  %v3333_v61 = vcombine.low %v242_v53, %v246_v54  ;;  %v3801_v1 = vld [vmem:[#allocation5 + $0x8] ss:$16 sps:$4 sm:$0xff]   ;;  %v3809_v3 = vld [vmem:[#allocation5 + $0x2c] ss:$16 sps:$4 sm:$0xff]   ;;  %v3812_v7 = vld [vmem:[#allocation5 + $0x44] ss:$16 sps:$4 sm:$0xff]  }
  0x66   :  { %334 = vmatpush1.bf16.msra.mxu0 %v3327_v33  ;;  %v3807_v5 = vld [vmem:[#allocation5 + $0x28] ss:$16 sps:$4 sm:$0xff]   ;;  %v3815_v8 = vld [vmem:[#allocation5 + $0x4c] ss:$16 sps:$4 sm:$0xff]   ;;  %v3810_v9 = vld [vmem:[#allocation5 + $0x40] ss:$16 sps:$4 sm:$0xff]  }
  0x67   :  { %413 = vmatprep.subr.bf16.mxu0 %v3324_v39  ;;  %v3813_v10 = vld [vmem:[#allocation5 + $0x48] ss:$16 sps:$4 sm:$0xff]   ;;  %v3818_v11 = vld [vmem:[#allocation5 + $0x64] ss:$16 sps:$4 sm:$0xff]   ;;  %v3821_v12 = vld [vmem:[#allocation5 + $0x6c] ss:$16 sps:$4 sm:$0xff]  }
  0x68   :  { %v3819_v14 = vld [vmem:[#allocation5 + $0x68] ss:$16 sps:$4 sm:$0xff]   ;;  %v3824_v15 = vld [vmem:[#allocation5 + $0x84] ss:$16 sps:$4 sm:$0xff]   ;;  %v3827_v17 = vld [vmem:[#allocation5 + $0x8c] ss:$16 sps:$4 sm:$0xff]  }
  0x69   :  { %v3822_v18 = vld [vmem:[#allocation5 + $0x80] ss:$16 sps:$4 sm:$0xff]   ;;  %v3837_v28 = vld [vmem:[#allocation5 + $0xc8] ss:$16 sps:$4 sm:$0xff]   ;;  %v3842_v29 = vld [vmem:[#allocation5 + $0xe4] ss:$16 sps:$4 sm:$0xff]  }
  0x6a   :  { %v3845_v30 = vld [vmem:[#allocation5 + $0xec] ss:$16 sps:$4 sm:$0xff]   ;;  %v3840_v31 = vld [vmem:[#allocation5 + $0xe0] ss:$16 sps:$4 sm:$0xff]   ;;  %v3843_v32 = vld [vmem:[#allocation5 + $0xe8] ss:$16 sps:$4 sm:$0xff]  }
  0x6b   :  { %v3848_v33 = vld [vmem:[#allocation5 + $0x104] ss:$16 sps:$4 sm:$0xff]   ;;  %v3849_v36 = vld [vmem:[#allocation5 + $0x108] ss:$16 sps:$4 sm:$0xff]   ;;  %v3857_v38 = vld [vmem:[#allocation5 + $0x12c] ss:$16 sps:$4 sm:$0xff]  }
  0x6c   :  { %v3854_v37 = vld [vmem:[#allocation5 + $0x124] ss:$16 sps:$4 sm:$0xff]   ;;  %v3852_v39 = vld [vmem:[#allocation5 + $0x120] ss:$16 sps:$4 sm:$0xff]   ;;  %v3855_v40 = vld [vmem:[#allocation5 + $0x128] ss:$16 sps:$4 sm:$0xff]  }
  0x6d   :  { %v3861_v44 = vld [vmem:[#allocation5 + $0x148] ss:$16 sps:$4 sm:$0xff]   ;;  %v3866_v45 = vld [vmem:[#allocation5 + $0x164] ss:$16 sps:$4 sm:$0xff]   ;;  %v3875_v50 = vld [vmem:[#allocation5 + $0x18c] ss:$16 sps:$4 sm:$0xff]  }
  0x6e   :  { %v3873_v52 = vld [vmem:[#allocation5 + $0x188] ss:$16 sps:$4 sm:$0xff]   ;;  %v3878_v53 = vld [vmem:[#allocation5 + $0x1a4] ss:$16 sps:$4 sm:$0xff]   ;;  %v3881_v54 = vld [vmem:[#allocation5 + $0x1ac] ss:$16 sps:$4 sm:$0xff]  }
 0x134   :  { %v153_v21 = vpop.f32.mrb[0].mxu0 }
 0x135   :  { %v159_v22 = vpack.c.bf16 %v153_v21, %v153_v21  ;;  %v3757_v23 = vpop.f32.mrb[1].mxu0  ;;  %v3830_v21 = vld [vmem:[#allocation5 + $0xa4] ss:$16 sps:$4 sm:$0xff]  }
 0x136   :  { %v156_v24 = vpop.f32.mrb[2].mxu0  ;;  %v3828_v23 = vld [vmem:[#allocation5 + $0xa0] ss:$16 sps:$4 sm:$0xff]  }
 0x137   :  { %v167_v25 = vadd.bf16 %v166_v20, %v159_v22  ;;  %v3758_v26 = vpop.f32.mrb[3].mxu0  ;;  %v3825_v20 = vld [vmem:[#allocation5 + $0x88] ss:$16 sps:$4 sm:$0xff]   ;;  %v3833_v22 = vld [vmem:[#allocation5 + $0xac] ss:$16 sps:$4 sm:$0xff]  }
 0x138   :  { %v3831_v24 = vld [vmem:[#allocation5 + $0xa8] ss:$16 sps:$4 sm:$0xff]   ;;  %v3839_v26 = vld [vmem:[#allocation5 + $0xcc] ss:$16 sps:$4 sm:$0xff]  }
 0x139   :  { %v168_v27 = vmax.bf16 %v4400_v6, %v167_v25  ;;  %v3836_v25 = vld [vmem:[#allocation5 + $0xc4] ss:$16 sps:$4 sm:$0xff]  }
 0x13b   :  { %3762 = vmatmul.mubr.msk.bf16.vlgmr.msra.gmra.mrb[0].mxu1 %vm177_vm3, %v168_v27  ;;  %v3834_v27 = vld [vmem:[#allocation5 + $0xc0] ss:$16 sps:$4 sm:$0xff]  }
 0x13c   :  { %373 = vmatpush1.bf16.msra.mxu1 %v3321_v13  ;;  %404 = vmatprep.mubr.bf16.mxu1 %v4400_v6  ;;  %v3816_v13 = vld [vmem:[#allocation5 + $0x60] ss:$16 sps:$4 sm:$0xff]  }
 0x13d   :  { %374 = vmatprep.subr.bf16.mxu1 %v3330_v35  ;;  %v3846_v35 = vld [vmem:[#allocation5 + $0x100] ss:$16 sps:$4 sm:$0xff]  }
 0x140   :  { %375 = vmatpush1.bf16.msra.mxu1 %v3329_v34  ;;  %v3851_v34 = vld [vmem:[#allocation5 + $0x10c] ss:$16 sps:$4 sm:$0xff]  }
 0x141   :  { %454 = vmatprep.subr.bf16.mxu1 %v3326_v43  ;;  %v3858_v43 = vld [vmem:[#allocation5 + $0x140] ss:$16 sps:$4 sm:$0xff]  }
 0x20e   :  { %v215_v47 = vpop.f32.mrb[0].mxu1 }
 0x20f   :  { %v221_v48 = vpack.c.bf16 %v215_v47, %v215_v47  ;;  %v3763_v49 = vpop.f32.mrb[1].mxu1  ;;  %v3864_v47 = vld [vmem:[#allocation5 + $0x160] ss:$16 sps:$4 sm:$0xff]  }
 0x210   :  { %v218_v51 = vpop.f32.mrb[2].mxu1  ;;  %v3872_v49 = vld [vmem:[#allocation5 + $0x184] ss:$16 sps:$4 sm:$0xff]  }
 0x211   :  { %v229_v55 = vadd.bf16 %v228_v46, %v221_v48  ;;  %v3764_v56 = vpop.f32.mrb[3].mxu1  ;;  %v3869_v46 = vld [vmem:[#allocation5 + $0x16c] ss:$16 sps:$4 sm:$0xff]   ;;  %v3867_v48 = vld [vmem:[#allocation5 + $0x168] ss:$16 sps:$4 sm:$0xff]  }
 0x212   :  { %v3870_v51 = vld [vmem:[#allocation5 + $0x180] ss:$16 sps:$4 sm:$0xff]   ;;  %v3879_v56 = vld [vmem:[#allocation5 + $0x1a8] ss:$16 sps:$4 sm:$0xff]  }
 0x213   :  { %v230_v57 = vmax.bf16 %v4400_v6, %v229_v55  ;;  %v3876_v55 = vld [vmem:[#allocation5 + $0x1a0] ss:$16 sps:$4 sm:$0xff]  }
 0x215   :  { %3335 = vmatmul.mubr.msk.bf16.vlgmr.msra.gmra.mrb[4].mxu0 %vm327_vm4, %v230_v57  ;;  %3336 = vmatmul.mubr.msk.bf16.vlgmr.msra.gmra.mrb[4].mxu1 %vm327_vm4, %v230_v57 }
 0x216   :  { %414 = vmatpush1.bf16.msra.mxu0 %v3323_v41  ;;  %455 = vmatpush1.bf16.msra.mxu1 %v3325_v42  ;;  %v3860_v41 = vld [vmem:[#allocation5 + $0x144] ss:$16 sps:$4 sm:$0xff]   ;;  %v3863_v42 = vld [vmem:[#allocation5 + $0x14c] ss:$16 sps:$4 sm:$0xff]  }
 0x217   :  { %415 = vmatprep.subr.bf16.mxu0 %v3332_v58  ;;  %456 = vmatprep.subr.bf16.mxu1 %v3334_v59  ;;  %v3887_v58 = vld [vmem:[#allocation5 + $0x1cc] ss:$16 sps:$4 sm:$0xff]   ;;  %v3882_v59 = vld [vmem:[#allocation5 + $0x1c0] ss:$16 sps:$4 sm:$0xff]  }
 0x218   :  { %445 = vmatprep.mubr.bf16.mxu0 %v4400_v6  ;;  %486 = vmatprep.mubr.bf16.mxu1 %v4400_v6 }
 0x21a   :  { %416 = vmatpush1.bf16.msra.mxu0 %v3331_v60  ;;  %457 = vmatpush1.bf16.msra.mxu1 %v3333_v61  ;;  %v3885_v60 = vld [vmem:[#allocation5 + $0x1c8] ss:$16 sps:$4 sm:$0xff]   ;;  %v3890_v61 = vld [vmem:[#allocation5 + $0x1e4] ss:$16 sps:$4 sm:$0xff]  }
 0x21b   :  { %1393 = vmatprep.subr.bf16.mxu0 %v3800_v62  ;;  %1475 = vmatprep.subr.bf16.mxu1 %v3803_v63  ;;  %v3893_v62 = vld [vmem:[#allocation5 + $0x1ec] ss:$16 sps:$4 sm:$0xff]   ;;  %v3888_v63 = vld [vmem:[#allocation5 + $0x1e0] ss:$16 sps:$4 sm:$0xff]  }
 0x21d   :  { %3337 = vmatmul.mubr.msk.bf16.vlgmr.msra.gmra.mrb[8].mxu0 %vm327_vm4, %v230_v57  ;;  %3338 = vmatmul.mubr.msk.bf16.vlgmr.msra.gmra.mrb[8].mxu1 %vm327_vm4, %v230_v57  ;;  %v3884_v57 = vld [vmem:[#allocation5 + $0x1c4] ss:$16 sps:$4 sm:$0xff]  }
 0x21e   :  { %1394 = vmatpush1.bf16.msra.mxu0 %v3798_v0  ;;  %1476 = vmatpush1.bf16.msra.mxu1 %v3801_v1  ;;  %v3891_v0 = vld [vmem:[#allocation5 + $0x1e8] ss:$16 sps:$4 sm:$0xff]   ;;  %v3897_v1 = vld [vmem:[#allocation5 + $0x204] ss:$16 sps:$4 sm:$0xff]  }
 0x21f   :  { %1395 = vmatprep.subr.bf16.mxu0 %v3806_v2  ;;  %1477 = vmatprep.subr.bf16.mxu1 %v3809_v3  ;;  %v3900_v2 = vld [vmem:[#allocation5 + $0x20c] ss:$16 sps:$4 sm:$0xff]   ;;  %v4401_v3 = vmov 1966171168  }
 0x222   :  { %1396 = vmatpush1.bf16.msra.mxu0 %v3804_v4  ;;  %1478 = vmatpush1.bf16.msra.mxu1 %v3807_v5  ;;  %v506_v4 = vunpack.c.l.s4 %v4401_v3  ;;  %v3901_v3 = vld [vmem:[#allocation5 + $0x220] ss:$16 sps:$4 sm:$0xff]  }
 0x223   :  { %1397 = vmatprep.subr.bf16.mxu0 %v3812_v7  ;;  %1479 = vmatprep.subr.bf16.mxu1 %v3815_v8  ;;  %v104_v8 = vld [vmem:[%s4678_s8 + $0x2] sm:$0xff] }
 0x224   :  { %v507_v5 = vunpack.c.0.s8 %v506_v4  ;;  %v3904_v4 = vld [vmem:[#allocation5 + $0x228] ss:$16 sps:$4 sm:$0xff]  }
 0x226   :  { %1398 = vmatpush1.bf16.msra.mxu0 %v3810_v9  ;;  %1480 = vmatpush1.bf16.msra.mxu1 %v3813_v10  ;;  %v4558_v7 = vsub.s32 %v507_v5, %v4535_v16  ;;  %v504_v10 = vcombine.high %v104_v8, %v104_v8 }
 0x227   :  { %1399 = vmatprep.subr.bf16.mxu0 %v3818_v11  ;;  %1481 = vmatprep.subr.bf16.mxu1 %v3821_v12 }
 0x228   :  { %v511_v9 = vrot.slane %v104_v8, %v4558_v7  ;;  %v518_v12 = vrot.slane %v504_v10, %v4558_v7 }
 0x22a   :  { %1400 = vmatpush1.bf16.msra.mxu0 %v3816_v13  ;;  %1482 = vmatpush1.bf16.msra.mxu1 %v3819_v14  ;;  %v519_v11 = vcombine.high %v511_v9, %v511_v9  ;;  %v520_v14 = vcombine.high %v518_v12, %v518_v12 }
 0x22b   :  { %1401 = vmatprep.subr.bf16.mxu0 %v3824_v15  ;;  %1483 = vmatprep.subr.bf16.mxu1 %v3827_v17  ;;  %v4567_v15 = vrot.slane %v511_v9, %v4558_v7 }
 0x22c   :  { %v541_v13 = vrot.slane %v519_v11, %v4558_v7  ;;  %v3909_v11 = vld [vmem:[#allocation5 + $0x244] ss:$16 sps:$4 sm:$0xff]  }
 0x22d   :  { %v554_v16 = vpack.i.b16 %v4567_v15, %v4567_v15 }
 0x22e   :  { %1402 = vmatpush1.bf16.msra.mxu0 %v3822_v18  ;;  %1484 = vmatpush1.bf16.msra.mxu1 %v3825_v20  ;;  %v551_v17 = vcombine.high %v541_v13, %v541_v13  ;;  %v534_v18 = vrot.slane %v518_v12, %v4558_v7  ;;  %v561_v20 = vpack.i.b16 %v541_v13, %v541_v13  ;;  %v3912_v12 = vld [vmem:[#allocation5 + $0x24c] ss:$16 sps:$4 sm:$0xff]  }
 0x22f   :  { %1403 = vmatprep.subr.bf16.mxu0 %v3830_v21  ;;  %1485 = vmatprep.subr.bf16.mxu1 %v3833_v22  ;;  %v548_v21 = vrot.slane %v520_v14, %v4558_v7 }
 0x230   :  { %v575_v22 = vpack.i.b16 %v551_v17, %v551_v17  ;;  %v3907_v17 = vld [vmem:[#allocation5 + $0x240] ss:$16 sps:$4 sm:$0xff]  }
 0x232   :  { %1404 = vmatpush1.bf16.msra.mxu0 %v3828_v23  ;;  %1486 = vmatpush1.bf16.msra.mxu1 %v3831_v24  ;;  %v559_v23 = vrot.slane %v554_v16, %v4541_v19  ;;  %v550_v24 = vcombine.high %v534_v18, %v534_v18  ;;  %v3910_v16 = vld [vmem:[#allocation5 + $0x248] ss:$16 sps:$4 sm:$0xff]  }
 0x233   :  { %1405 = vmatprep.subr.bf16.mxu0 %v3836_v25  ;;  %1487 = vmatprep.subr.bf16.mxu1 %v3839_v26 }
 0x236   :  { %1406 = vmatpush1.bf16.msra.mxu0 %v3834_v27  ;;  %1488 = vmatpush1.bf16.msra.mxu1 %v3837_v28  ;;  %v566_v27 = vrot.slane %v561_v20, %v4541_v19  ;;  %v552_v28 = vcombine.high %v548_v21, %v548_v21  ;;  %v3918_v20 = vld [vmem:[#allocation5 + $0x26c] ss:$16 sps:$4 sm:$0xff]  }
 0x237   :  { %1407 = vmatprep.subr.bf16.mxu0 %v3842_v29  ;;  %1489 = vmatprep.subr.bf16.mxu1 %v3845_v30 }
 0x23a   :  { %1408 = vmatpush1.bf16.msra.mxu0 %v3840_v31  ;;  %1490 = vmatpush1.bf16.msra.mxu1 %v3843_v32  ;;  %v580_v32 = vrot.slane %v575_v22, %v4541_v19  ;;  %v3916_v22 = vld [vmem:[#allocation5 + $0x268] ss:$16 sps:$4 sm:$0xff]  }
 0x23b   :  { %1409 = vmatprep.subr.bf16.mxu0 %v3848_v33  ;;  %1491 = vmatprep.subr.bf16.mxu1 %v3851_v34 }
 0x23e   :  { %1410 = vmatpush1.bf16.msra.mxu0 %v3846_v35  ;;  %1492 = vmatpush1.bf16.msra.mxu1 %v3849_v36 }
 0x23f   :  { %1411 = vmatprep.subr.bf16.mxu0 %v3854_v37  ;;  %1493 = vmatprep.subr.bf16.mxu1 %v3857_v38 }
 0x242   :  { %1412 = vmatpush1.bf16.msra.mxu0 %v3852_v39  ;;  %1494 = vmatpush1.bf16.msra.mxu1 %v3855_v40  ;;  %v582_v40 = vpack.i.b16 %v534_v18, %v534_v18  ;;  %v3915_v18 = vld [vmem:[#allocation5 + $0x264] ss:$16 sps:$4 sm:$0xff]  }
 0x243   :  { %1413 = vmatprep.subr.bf16.mxu0 %v3860_v41  ;;  %1495 = vmatprep.subr.bf16.mxu1 %v3863_v42  ;;  %v596_v41 = vpack.i.b16 %v550_v24, %v550_v24  ;;  %v3924_v24 = vld [vmem:[#allocation5 + $0x28c] ss:$16 sps:$4 sm:$0xff]  }
 0x246   :  { %1414 = vmatpush1.bf16.msra.mxu0 %v3858_v43  ;;  %1496 = vmatpush1.bf16.msra.mxu1 %v3861_v44  ;;  %v589_v43 = vpack.i.b16 %v548_v21, %v548_v21  ;;  %v603_v44 = vpack.i.b16 %v552_v28, %v552_v28  ;;  %v3913_v21 = vld [vmem:[#allocation5 + $0x260] ss:$16 sps:$4 sm:$0xff]   ;;  %v3927_v28 = vld [vmem:[#allocation5 + $0x2a4] ss:$16 sps:$4 sm:$0xff]  }
 0x247   :  { %1415 = vmatprep.subr.bf16.mxu0 %v3866_v45  ;;  %1497 = vmatprep.subr.bf16.mxu1 %v3869_v46 }
 0x24a   :  { %1416 = vmatpush1.bf16.msra.mxu0 %v3864_v47  ;;  %1498 = vmatpush1.bf16.msra.mxu1 %v3867_v48  ;;  %v3895_v47 = vld [vmem:[#allocation5 + $0x200] ss:$16 sps:$4 sm:$0xff]   ;;  %v3898_v48 = vld [vmem:[#allocation5 + $0x208] ss:$16 sps:$4 sm:$0xff]  }
 0x24b   :  { %1417 = vmatprep.subr.bf16.mxu0 %v3872_v49  ;;  %1499 = vmatprep.subr.bf16.mxu1 %v3875_v50  ;;  %v587_v50 = vrot.slane %v582_v40, %v4541_v19  ;;  %v3945_v40 = vld [vmem:[#allocation5 + $0x304] ss:$16 sps:$4 sm:$0xff]  }
 0x24e   :  { %1418 = vmatpush1.bf16.msra.mxu0 %v3870_v51  ;;  %1500 = vmatpush1.bf16.msra.mxu1 %v3873_v52  ;;  %v601_v51 = vrot.slane %v596_v41, %v4541_v19  ;;  %v3948_v41 = vld [vmem:[#allocation5 + $0x30c] ss:$16 sps:$4 sm:$0xff]  }
 0x24f   :  { %1419 = vmatprep.subr.bf16.mxu0 %v3878_v53  ;;  %1501 = vmatprep.subr.bf16.mxu1 %v3881_v54  ;;  %v594_v54 = vrot.slane %v589_v43, %v4541_v19  ;;  %v3946_v43 = vld [vmem:[#allocation5 + $0x308] ss:$16 sps:$4 sm:$0xff]  }
 0x252   :  { %1420 = vmatpush1.bf16.msra.mxu0 %v3876_v55  ;;  %1502 = vmatpush1.bf16.msra.mxu1 %v3879_v56  ;;  %v608_v55 = vrot.slane %v603_v44, %v4541_v19  ;;  %v3903_v56 = vld [vmem:[#allocation5 + $0x224] ss:$16 sps:$4 sm:$0xff]  }
 0x253   :  { %1421 = vmatprep.subr.bf16.mxu0 %v3884_v57  ;;  %1503 = vmatprep.subr.bf16.mxu1 %v3887_v58  ;;  %v3906_v57 = vld [vmem:[#allocation5 + $0x22c] ss:$16 sps:$4 sm:$0xff]   ;;  %v3951_v44 = vld [vmem:[#allocation5 + $0x324] ss:$16 sps:$4 sm:$0xff]  }
 0x256   :  { %1422 = vmatpush1.bf16.msra.mxu0 %v3882_v59  ;;  %1504 = vmatpush1.bf16.msra.mxu1 %v3885_v60 }
 0x257   :  { %1423 = vmatprep.subr.bf16.mxu0 %v3890_v61  ;;  %1505 = vmatprep.subr.bf16.mxu1 %v3893_v62 }
 0x25a   :  { %1424 = vmatpush1.bf16.msra.mxu0 %v3888_v63  ;;  %1506 = vmatpush1.bf16.msra.mxu1 %v3891_v0 }
 0x25b   :  { %1434 = vmatprep.subr.bf16.mxu0 %v3897_v1  ;;  %1516 = vmatprep.subr.bf16.mxu1 %v3900_v2 }
 0x2e8   :  { %v365_v25 = vpop.f32.mrb[4].mxu0  ;;  %v4574_v26 = vpop.f32.mrb[4].mxu1 }
 0x2e9   :  { %v495_v29 = vpack.c.bf16 %v365_v25, %v365_v25  ;;  %v367_v30 = vpop.f32.mrb[5].mxu0  ;;  %v408_v31 = vpop.f32.mrb[5].mxu1  ;;  %v3919_v25 = vld [vmem:[#allocation5 + $0x280] ss:$16 sps:$4 sm:$0xff]  }
 0x2ea   :  { %v496_v33 = vpack.c.bf16 %v367_v30, %v367_v30  ;;  %v498_v34 = vpack.c.bf16 %v408_v31, %v408_v31  ;;  %v369_v35 = vpop.f32.mrb[6].mxu0  ;;  %v410_v36 = vpop.f32.mrb[6].mxu1  ;;  %v3925_v30 = vld [vmem:[#allocation5 + $0x2a0] ss:$16 sps:$4 sm:$0xff]   ;;  %v3928_v31 = vld [vmem:[#allocation5 + $0x2a8] ss:$16 sps:$4 sm:$0xff]  }
 0x2eb   :  { %v609_v37 = vadd.bf16 %v559_v23, %v495_v29  ;;  %v370_v38 = vpop.f32.mrb[7].mxu0  ;;  %v411_v39 = vpop.f32.mrb[7].mxu1  ;;  %v3921_v23 = vld [vmem:[#allocation5 + $0x284] ss:$16 sps:$4 sm:$0xff]   ;;  %v3930_v29 = vld [vmem:[#allocation5 + $0x2ac] ss:$16 sps:$4 sm:$0xff]  }
 0x2ec   :  { %v610_v42 = vadd.bf16 %v566_v27, %v496_v33  ;;  %v612_v45 = vadd.bf16 %v580_v32, %v498_v34  ;;  %v3922_v27 = vld [vmem:[#allocation5 + $0x288] ss:$16 sps:$4 sm:$0xff]   ;;  %v3933_v32 = vld [vmem:[#allocation5 + $0x2c4] ss:$16 sps:$4 sm:$0xff]   ;;  %v3936_v33 = vld [vmem:[#allocation5 + $0x2cc] ss:$16 sps:$4 sm:$0xff]  }
 0x2ed   :  { %v617_v49 = vmax.bf16 %v4400_v6, %v609_v37  ;;  %v3931_v34 = vld [vmem:[#allocation5 + $0x2c0] ss:$16 sps:$4 sm:$0xff]   ;;  %v3934_v35 = vld [vmem:[#allocation5 + $0x2c8] ss:$16 sps:$4 sm:$0xff]   ;;  %v3939_v36 = vld [vmem:[#allocation5 + $0x2e4] ss:$16 sps:$4 sm:$0xff]  }
 0x2ee   :  { %v618_v46 = vmax.bf16 %v4400_v6, %v610_v42  ;;  %v620_v62 = vmax.bf16 %v4400_v6, %v612_v45  ;;  %v3942_v37 = vld [vmem:[#allocation5 + $0x2ec] ss:$16 sps:$4 sm:$0xff]   ;;  %v3937_v38 = vld [vmem:[#allocation5 + $0x2e0] ss:$16 sps:$4 sm:$0xff]   ;;  %v3940_v39 = vld [vmem:[#allocation5 + $0x2e8] ss:$16 sps:$4 sm:$0xff]  }
 0x2ef   :  { %v3943_v42 = vld [vmem:[#allocation5 + $0x300] ss:$16 sps:$4 sm:$0xff]   ;;  %v3954_v45 = vld [vmem:[#allocation5 + $0x32c] ss:$16 sps:$4 sm:$0xff]  }
 0x2f0   :  { %v447_v52 = vpop.f32.mrb[8].mxu0  ;;  %v488_v53 = vpop.f32.mrb[8].mxu1  ;;  %1425 = vmatprep.mubr.bf16.mxu0 %v618_v46  ;;  %1507 = vmatprep.mubr.bf16.mxu1 %v618_v46  ;;  %v3949_v46 = vld [vmem:[#allocation5 + $0x320] ss:$16 sps:$4 sm:$0xff]  }
 0x2f1   :  { %v499_v58 = vpack.c.bf16 %v447_v52, %v447_v52  ;;  %v501_v59 = vpack.c.bf16 %v488_v53, %v488_v53  ;;  %v449_v60 = vpop.f32.mrb[9].mxu0  ;;  %v490_v61 = vpop.f32.mrb[9].mxu1  ;;  %1426 = vmatmul.mubr.bf16.vlgmr.msra.gmra.mrb[12].mxu0 %v617_v49  ;;  %1508 = vmatmul.mubr.bf16.vlgmr.msra.gmra.mrb[12].mxu1 %v617_v49  ;;  %v3960_v49 = vld [vmem:[#allocation5 + $0x34c] ss:$16 sps:$4 sm:$0xff]   ;;  %v3963_v52 = vld [vmem:[#allocation5 + $0x364] ss:$16 sps:$4 sm:$0xff]  }
 0x2f2   :  { %v500_v63 = vpack.c.bf16 %v449_v60, %v449_v60  ;;  %v502_v0 = vpack.c.bf16 %v490_v61, %v490_v61  ;;  %1435 = vmatpush1.bf16.msra.mxu0 %v3895_v47  ;;  %1517 = vmatpush1.bf16.msra.mxu1 %v3898_v48  ;;  %v451_v1 = vpop.f32.mrb[10].mxu0  ;;  %v492_v2 = vpop.f32.mrb[10].mxu1  ;;  %v3952_v47 = vld [vmem:[#allocation5 + $0x328] ss:$16 sps:$4 sm:$0xff]   ;;  %v3957_v48 = vld [vmem:[#allocation5 + $0x344] ss:$16 sps:$4 sm:$0xff]   ;;  %v549_v60 = vcombine.high %v4567_v15, %v4567_v15 }
 0x2f3   :  { %v4585_v5 = vadd.bf16 %v587_v50, %v499_v58  ;;  %v4587_v8 = vadd.bf16 %v601_v51, %v501_v59  ;;  %1466 = vmatprep.mubr.bf16.mxu0 %v620_v62  ;;  %1548 = vmatprep.mubr.bf16.mxu1 %v620_v62  ;;  %v452_v9 = vpop.f32.mrb[11].mxu0  ;;  %v493_v10 = vpop.f32.mrb[11].mxu1  ;;  %v3955_v50 = vld [vmem:[#allocation5 + $0x340] ss:$16 sps:$4 sm:$0xff]   ;;  %v3958_v51 = vld [vmem:[#allocation5 + $0x348] ss:$16 sps:$4 sm:$0xff]   ;;  %v497_v15 = vpack.c.bf16 %v4574_v26, %v4574_v26 }
 0x2f4   :  { %v4589_v13 = vadd.bf16 %v594_v54, %v500_v63  ;;  %v4591_v14 = vadd.bf16 %v608_v55, %v502_v0  ;;  %1436 = vmatprep.subr.bf16.mxu0 %v3903_v56  ;;  %1518 = vmatprep.subr.bf16.mxu1 %v3906_v57  ;;  %v3966_v53 = vld [vmem:[#allocation5 + $0x36c] ss:$16 sps:$4 sm:$0xff]   ;;  %v3961_v54 = vld [vmem:[#allocation5 + $0x360] ss:$16 sps:$4 sm:$0xff]   ;;  %v3964_v55 = vld [vmem:[#allocation5 + $0x368] ss:$16 sps:$4 sm:$0xff]   ;;  %v568_v1 = vpack.i.b16 %v549_v60, %v549_v60 }
 0x2f5   :  { %v3969_v56 = vld [vmem:[#allocation5 + $0x384] ss:$16 sps:$4 sm:$0xff]   ;;  %v3972_v57 = vld [vmem:[#allocation5 + $0x38c] ss:$16 sps:$4 sm:$0xff]   ;;  %v3967_v58 = vld [vmem:[#allocation5 + $0x380] ss:$16 sps:$4 sm:$0xff]  }
 0x2f6   :  { %1437 = vmatpush1.bf16.msra.mxu0 %v3901_v3  ;;  %1519 = vmatpush1.bf16.msra.mxu1 %v3904_v4  ;;  %v3970_v59 = vld [vmem:[#allocation5 + $0x388] ss:$16 sps:$4 sm:$0xff]   ;;  %v3975_v61 = vld [vmem:[#allocation5 + $0x3a4] ss:$16 sps:$4 sm:$0xff]   ;;  %v3978_v62 = vld [vmem:[#allocation5 + $0x3ac] ss:$16 sps:$4 sm:$0xff]   ;;  %v573_v10 = vrot.slane %v568_v1, %v4541_v19 }
 0x2f7   :  { %1438 = vmatprep.subr.bf16.mxu0 %v3909_v11  ;;  %1520 = vmatprep.subr.bf16.mxu1 %v3912_v12  ;;  %v3973_v63 = vld [vmem:[#allocation5 + $0x3a0] ss:$16 sps:$4 sm:$0xff]   ;;  %v3976_v0 = vld [vmem:[#allocation5 + $0x3a8] ss:$16 sps:$4 sm:$0xff]   ;;  %v3981_v2 = vld [vmem:[#allocation5 + $0x3c4] ss:$16 sps:$4 sm:$0xff]  }
 0x2f8   :  { %v3984_v3 = vld [vmem:[#allocation5 + $0x3cc] ss:$16 sps:$4 sm:$0xff]   ;;  %v3979_v4 = vld [vmem:[#allocation5 + $0x3c0] ss:$16 sps:$4 sm:$0xff]   ;;  %v3982_v9 = vld [vmem:[#allocation5 + $0x3c8] ss:$16 sps:$4 sm:$0xff]  }
 0x2f9   :  { %v3987_v11 = vld [vmem:[#allocation5 + $0x3e4] ss:$16 sps:$4 sm:$0xff]   ;;  %v3990_v12 = vld [vmem:[#allocation5 + $0x3ec] ss:$16 sps:$4 sm:$0xff]   ;;  %v4048_v60 = vld [vmem:[#allocation7 + $0x128] ss:$16 sps:$4 sm:$0xff]  }
 0x2fa   :  { %1439 = vmatpush1.bf16.msra.mxu0 %v3907_v17  ;;  %1521 = vmatpush1.bf16.msra.mxu1 %v3910_v16  ;;  %v3985_v17 = vld [vmem:[#allocation5 + $0x3e0] ss:$16 sps:$4 sm:$0xff]   ;;  %v3988_v16 = vld [vmem:[#allocation5 + $0x3e8] ss:$16 sps:$4 sm:$0xff]   ;;  %v4059_v1 = vld [vmem:[#allocation7 + $0x164] ss:$16 sps:$4 sm:$0xff]  }
 0x2fb   :  { %1440 = vmatprep.subr.bf16.mxu0 %v3915_v18  ;;  %1522 = vmatprep.subr.bf16.mxu1 %v3918_v20  ;;  %v611_v18 = vadd.bf16 %v573_v10, %v497_v15  ;;  %v3993_v20 = vld [vmem:[#allocation7 + $0x4] ss:$16 sps:$4 sm:$0xff]   ;;  %v4068_v15 = vld [vmem:[#allocation7 + $0x18c] ss:$16 sps:$4 sm:$0xff]   ;;  %v4063_v10 = vld [vmem:[#allocation7 + $0x180] ss:$16 sps:$4 sm:$0xff]  }
 0x2fd   :  { %v619_v26 = vmax.bf16 %v4400_v6, %v611_v18  ;;  %v4072_v18 = vld [vmem:[#allocation7 + $0x1a8] ss:$16 sps:$4 sm:$0xff]  }
 0x2fe   :  { %1441 = vmatpush1.bf16.msra.mxu0 %v3913_v21  ;;  %1523 = vmatpush1.bf16.msra.mxu1 %v3916_v22  ;;  %v3996_v21 = vld [vmem:[#allocation7 + $0xc] ss:$16 sps:$4 sm:$0xff]   ;;  %v3991_v22 = vld [vmem:[#allocation7] ss:$16 sps:$4 sm:$0xff]  }
 0x2ff   :  { %1442 = vmatprep.subr.bf16.mxu0 %v3921_v23  ;;  %1524 = vmatprep.subr.bf16.mxu1 %v3924_v24  ;;  %v3994_v23 = vld [vmem:[#allocation7 + $0x8] ss:$16 sps:$4 sm:$0xff]   ;;  %v622_v24 = vmax.bf16 %v4400_v6, %v4589_v13  ;;  %v4011_v13 = vld [vmem:[#allocation7 + $0x64] ss:$16 sps:$4 sm:$0xff]  }
 0x302   :  { %1443 = vmatpush1.bf16.msra.mxu0 %v3919_v25  ;;  %1525 = vmatpush1.bf16.msra.mxu1 %v3922_v27  ;;  %v3999_v25 = vld [vmem:[#allocation7 + $0x24] ss:$16 sps:$4 sm:$0xff]   ;;  %v4002_v27 = vld [vmem:[#allocation7 + $0x2c] ss:$16 sps:$4 sm:$0xff]  }
 0x303   :  { %1444 = vmatprep.subr.bf16.mxu0 %v3927_v28  ;;  %1526 = vmatprep.subr.bf16.mxu1 %v3930_v29  ;;  %v3997_v28 = vld [vmem:[#allocation7 + $0x20] ss:$16 sps:$4 sm:$0xff]   ;;  %v4000_v29 = vld [vmem:[#allocation7 + $0x28] ss:$16 sps:$4 sm:$0xff]  }
 0x306   :  { %1445 = vmatpush1.bf16.msra.mxu0 %v3925_v30  ;;  %1527 = vmatpush1.bf16.msra.mxu1 %v3928_v31  ;;  %v4005_v30 = vld [vmem:[#allocation7 + $0x44] ss:$16 sps:$4 sm:$0xff]   ;;  %v4008_v31 = vld [vmem:[#allocation7 + $0x4c] ss:$16 sps:$4 sm:$0xff]  }
 0x307   :  { %1446 = vmatprep.subr.bf16.mxu0 %v3933_v32  ;;  %1528 = vmatprep.subr.bf16.mxu1 %v3936_v33  ;;  %v4003_v32 = vld [vmem:[#allocation7 + $0x40] ss:$16 sps:$4 sm:$0xff]   ;;  %v4006_v33 = vld [vmem:[#allocation7 + $0x48] ss:$16 sps:$4 sm:$0xff]  }
 0x30a   :  { %1447 = vmatpush1.bf16.msra.mxu0 %v3931_v34  ;;  %1529 = vmatpush1.bf16.msra.mxu1 %v3934_v35  ;;  %v4014_v34 = vld [vmem:[#allocation7 + $0x6c] ss:$16 sps:$4 sm:$0xff]   ;;  %v4009_v35 = vld [vmem:[#allocation7 + $0x60] ss:$16 sps:$4 sm:$0xff]  }
 0x30b   :  { %1448 = vmatprep.subr.bf16.mxu0 %v3939_v36  ;;  %1530 = vmatprep.subr.bf16.mxu1 %v3942_v37  ;;  %v4012_v36 = vld [vmem:[#allocation7 + $0x68] ss:$16 sps:$4 sm:$0xff]   ;;  %v4017_v37 = vld [vmem:[#allocation7 + $0x84] ss:$16 sps:$4 sm:$0xff]  }
 0x30e   :  { %1449 = vmatpush1.bf16.msra.mxu0 %v3937_v38  ;;  %1531 = vmatpush1.bf16.msra.mxu1 %v3940_v39  ;;  %v4020_v38 = vld [vmem:[#allocation7 + $0x8c] ss:$16 sps:$4 sm:$0xff]   ;;  %v4015_v39 = vld [vmem:[#allocation7 + $0x80] ss:$16 sps:$4 sm:$0xff]  }
 0x30f   :  { %1450 = vmatprep.subr.bf16.mxu0 %v3945_v40  ;;  %1532 = vmatprep.subr.bf16.mxu1 %v3948_v41  ;;  %v4018_v40 = vld [vmem:[#allocation7 + $0x88] ss:$16 sps:$4 sm:$0xff]   ;;  %v4023_v41 = vld [vmem:[#allocation7 + $0xa4] ss:$16 sps:$4 sm:$0xff]  }
 0x312   :  { %1451 = vmatpush1.bf16.msra.mxu0 %v3943_v42  ;;  %1533 = vmatpush1.bf16.msra.mxu1 %v3946_v43  ;;  %v4026_v42 = vld [vmem:[#allocation7 + $0xac] ss:$16 sps:$4 sm:$0xff]   ;;  %v4021_v43 = vld [vmem:[#allocation7 + $0xa0] ss:$16 sps:$4 sm:$0xff]  }
 0x313   :  { %1452 = vmatprep.subr.bf16.mxu0 %v3951_v44  ;;  %1534 = vmatprep.subr.bf16.mxu1 %v3954_v45  ;;  %v4024_v44 = vld [vmem:[#allocation7 + $0xa8] ss:$16 sps:$4 sm:$0xff]   ;;  %v4029_v45 = vld [vmem:[#allocation7 + $0xc4] ss:$16 sps:$4 sm:$0xff]  }
 0x316   :  { %1453 = vmatpush1.bf16.msra.mxu0 %v3949_v46  ;;  %1535 = vmatpush1.bf16.msra.mxu1 %v3952_v47  ;;  %v4032_v46 = vld [vmem:[#allocation7 + $0xcc] ss:$16 sps:$4 sm:$0xff]   ;;  %v4027_v47 = vld [vmem:[#allocation7 + $0xc0] ss:$16 sps:$4 sm:$0xff]  }
 0x317   :  { %1454 = vmatprep.subr.bf16.mxu0 %v3957_v48  ;;  %1536 = vmatprep.subr.bf16.mxu1 %v3960_v49  ;;  %v4030_v48 = vld [vmem:[#allocation7 + $0xc8] ss:$16 sps:$4 sm:$0xff]   ;;  %v4035_v49 = vld [vmem:[#allocation7 + $0xe4] ss:$16 sps:$4 sm:$0xff]  }
 0x31a   :  { %1455 = vmatpush1.bf16.msra.mxu0 %v3955_v50  ;;  %1537 = vmatpush1.bf16.msra.mxu1 %v3958_v51  ;;  %v4038_v50 = vld [vmem:[#allocation7 + $0xec] ss:$16 sps:$4 sm:$0xff]   ;;  %v4033_v51 = vld [vmem:[#allocation7 + $0xe0] ss:$16 sps:$4 sm:$0xff]  }
 0x31b   :  { %1456 = vmatprep.subr.bf16.mxu0 %v3963_v52  ;;  %1538 = vmatprep.subr.bf16.mxu1 %v3966_v53  ;;  %v4036_v52 = vld [vmem:[#allocation7 + $0xe8] ss:$16 sps:$4 sm:$0xff]   ;;  %v4041_v53 = vld [vmem:[#allocation7 + $0x104] ss:$16 sps:$4 sm:$0xff]  }
 0x31e   :  { %1457 = vmatpush1.bf16.msra.mxu0 %v3961_v54  ;;  %1539 = vmatpush1.bf16.msra.mxu1 %v3964_v55  ;;  %v4044_v54 = vld [vmem:[#allocation7 + $0x10c] ss:$16 sps:$4 sm:$0xff]   ;;  %v4039_v55 = vld [vmem:[#allocation7 + $0x100] ss:$16 sps:$4 sm:$0xff]  }
 0x31f   :  { %1458 = vmatprep.subr.bf16.mxu0 %v3969_v56  ;;  %1540 = vmatprep.subr.bf16.mxu1 %v3972_v57  ;;  %v4042_v56 = vld [vmem:[#allocation7 + $0x108] ss:$16 sps:$4 sm:$0xff]   ;;  %v4047_v57 = vld [vmem:[#allocation7 + $0x124] ss:$16 sps:$4 sm:$0xff]  }
 0x322   :  { %1459 = vmatpush1.bf16.msra.mxu0 %v3967_v58  ;;  %1541 = vmatpush1.bf16.msra.mxu1 %v3970_v59  ;;  %v4050_v58 = vld [vmem:[#allocation7 + $0x12c] ss:$16 sps:$4 sm:$0xff]   ;;  %v4045_v59 = vld [vmem:[#allocation7 + $0x120] ss:$16 sps:$4 sm:$0xff]  }
 0x323   :  { %1460 = vmatprep.subr.bf16.mxu0 %v3975_v61  ;;  %1542 = vmatprep.subr.bf16.mxu1 %v3978_v62  ;;  %v4053_v61 = vld [vmem:[#allocation7 + $0x144] ss:$16 sps:$4 sm:$0xff]   ;;  %v4056_v62 = vld [vmem:[#allocation7 + $0x14c] ss:$16 sps:$4 sm:$0xff]  }
 0x326   :  { %1461 = vmatpush1.bf16.msra.mxu0 %v3973_v63  ;;  %1543 = vmatpush1.bf16.msra.mxu1 %v3976_v0  ;;  %v4051_v63 = vld [vmem:[#allocation7 + $0x140] ss:$16 sps:$4 sm:$0xff]   ;;  %v4054_v0 = vld [vmem:[#allocation7 + $0x148] ss:$16 sps:$4 sm:$0xff]  }
 0x327   :  { %1462 = vmatprep.subr.bf16.mxu0 %v3981_v2  ;;  %1544 = vmatprep.subr.bf16.mxu1 %v3984_v3  ;;  %v4062_v2 = vld [vmem:[#allocation7 + $0x16c] ss:$16 sps:$4 sm:$0xff]   ;;  %v4057_v3 = vld [vmem:[#allocation7 + $0x160] ss:$16 sps:$4 sm:$0xff]  }
 0x32a   :  { %1463 = vmatpush1.bf16.msra.mxu0 %v3979_v4  ;;  %1545 = vmatpush1.bf16.msra.mxu1 %v3982_v9  ;;  %v4060_v4 = vld [vmem:[#allocation7 + $0x168] ss:$16 sps:$4 sm:$0xff]   ;;  %v4065_v9 = vld [vmem:[#allocation7 + $0x184] ss:$16 sps:$4 sm:$0xff]  }
 0x32b   :  { %1464 = vmatprep.subr.bf16.mxu0 %v3987_v11  ;;  %1546 = vmatprep.subr.bf16.mxu1 %v3990_v12  ;;  %v4066_v11 = vld [vmem:[#allocation7 + $0x188] ss:$16 sps:$4 sm:$0xff]   ;;  %v4071_v12 = vld [vmem:[#allocation7 + $0x1a4] ss:$16 sps:$4 sm:$0xff]  }
 0x32e   :  { %1465 = vmatpush1.bf16.msra.mxu0 %v3985_v17  ;;  %1547 = vmatpush1.bf16.msra.mxu1 %v3988_v16  ;;  %v4074_v17 = vld [vmem:[#allocation7 + $0x1ac] ss:$16 sps:$4 sm:$0xff]   ;;  %v4069_v16 = vld [vmem:[#allocation7 + $0x1a0] ss:$16 sps:$4 sm:$0xff]  }
 0x32f   :  { %2390 = vmatprep.subr.bf16.mxu0 %v3993_v20  ;;  %2472 = vmatprep.subr.bf16.mxu1 %v3996_v21  ;;  %v4077_v20 = vld [vmem:[#allocation7 + $0x1c4] ss:$16 sps:$4 sm:$0xff]   ;;  %v4080_v21 = vld [vmem:[#allocation7 + $0x1cc] ss:$16 sps:$4 sm:$0xff]  }
 0x331   :  { %1467 = vmatmul.mubr.bf16.vlgmr.msra.gmra.mrb[12].mxu0 %v619_v26  ;;  %1549 = vmatmul.mubr.bf16.vlgmr.msra.gmra.mrb[12].mxu1 %v619_v26  ;;  %v4078_v26 = vld [vmem:[#allocation7 + $0x1c8] ss:$16 sps:$4 sm:$0xff]  }
 0x332   :  { %2391 = vmatpush1.bf16.msra.mxu0 %v3991_v22  ;;  %2422 = vmatprep.mubr.bf16.mxu0 %v622_v24  ;;  %v4075_v22 = vld [vmem:[#allocation7 + $0x1c0] ss:$16 sps:$4 sm:$0xff]  }
 0x333   :  { %2473 = vmatpush1.bf16.msra.mxu1 %v3994_v23  ;;  %2504 = vmatprep.mubr.bf16.mxu1 %v622_v24  ;;  %v4083_v23 = vld [vmem:[#allocation7 + $0x1e4] ss:$16 sps:$4 sm:$0xff]   ;;  %v4086_v24 = vld [vmem:[#allocation7 + $0x1ec] ss:$16 sps:$4 sm:$0xff]  }
 0x334   :  { %2392 = vmatprep.subr.bf16.mxu0 %v3999_v25  ;;  %2474 = vmatprep.subr.bf16.mxu1 %v4002_v27  ;;  %v4081_v25 = vld [vmem:[#allocation7 + $0x1e0] ss:$16 sps:$4 sm:$0xff]   ;;  %v4084_v27 = vld [vmem:[#allocation7 + $0x1e8] ss:$16 sps:$4 sm:$0xff]  }
 0x336   :  { %2393 = vmatpush1.bf16.msra.mxu0 %v3997_v28  ;;  %v4089_v28 = vld [vmem:[#allocation7 + $0x204] ss:$16 sps:$4 sm:$0xff]  }
 0x337   :  { %2475 = vmatpush1.bf16.msra.mxu1 %v4000_v29  ;;  %2394 = vmatprep.subr.bf16.mxu0 %v4005_v30  ;;  %v4092_v29 = vld [vmem:[#allocation7 + $0x20c] ss:$16 sps:$4 sm:$0xff]   ;;  %v4087_v30 = vld [vmem:[#allocation7 + $0x200] ss:$16 sps:$4 sm:$0xff]  }
 0x338   :  { %2476 = vmatprep.subr.bf16.mxu1 %v4008_v31  ;;  %v621_v31 = vmax.bf16 %v4400_v6, %v4585_v5  ;;  %v4104_v5 = vld [vmem:[#allocation7 + $0x24c] ss:$16 sps:$4 sm:$0xff]  }
 0x33a   :  { %2395 = vmatpush1.bf16.msra.mxu0 %v4003_v32  ;;  %v4090_v32 = vld [vmem:[#allocation7 + $0x208] ss:$16 sps:$4 sm:$0xff]  }
 0x33b   :  { %2477 = vmatpush1.bf16.msra.mxu1 %v4006_v33  ;;  %2396 = vmatprep.subr.bf16.mxu0 %v4011_v13  ;;  %v4095_v33 = vld [vmem:[#allocation7 + $0x224] ss:$16 sps:$4 sm:$0xff]   ;;  %v624_v13 = vmax.bf16 %v4400_v6, %v4591_v14  ;;  %v4110_v14 = vld [vmem:[#allocation7 + $0x26c] ss:$16 sps:$4 sm:$0xff]  }
 0x33c   :  { %2478 = vmatprep.subr.bf16.mxu1 %v4014_v34  ;;  %v4098_v34 = vld [vmem:[#allocation7 + $0x22c] ss:$16 sps:$4 sm:$0xff]  }
 0x33e   :  { %2397 = vmatpush1.bf16.msra.mxu0 %v4009_v35  ;;  %v4093_v35 = vld [vmem:[#allocation7 + $0x220] ss:$16 sps:$4 sm:$0xff]  }
 0x33f   :  { %2479 = vmatpush1.bf16.msra.mxu1 %v4012_v36  ;;  %2398 = vmatprep.subr.bf16.mxu0 %v4017_v37  ;;  %v4096_v36 = vld [vmem:[#allocation7 + $0x228] ss:$16 sps:$4 sm:$0xff]   ;;  %v4101_v37 = vld [vmem:[#allocation7 + $0x244] ss:$16 sps:$4 sm:$0xff]  }
 0x340   :  { %2480 = vmatprep.subr.bf16.mxu1 %v4020_v38  ;;  %v4099_v38 = vld [vmem:[#allocation7 + $0x240] ss:$16 sps:$4 sm:$0xff]  }
 0x342   :  { %2399 = vmatpush1.bf16.msra.mxu0 %v4015_v39  ;;  %v4102_v39 = vld [vmem:[#allocation7 + $0x248] ss:$16 sps:$4 sm:$0xff]  }
 0x343   :  { %2481 = vmatpush1.bf16.msra.mxu1 %v4018_v40  ;;  %2400 = vmatprep.subr.bf16.mxu0 %v4023_v41  ;;  %v4107_v40 = vld [vmem:[#allocation7 + $0x264] ss:$16 sps:$4 sm:$0xff]   ;;  %v4105_v41 = vld [vmem:[#allocation7 + $0x260] ss:$16 sps:$4 sm:$0xff]  }
 0x344   :  { %2482 = vmatprep.subr.bf16.mxu1 %v4026_v42  ;;  %v4108_v42 = vld [vmem:[#allocation7 + $0x268] ss:$16 sps:$4 sm:$0xff]  }
 0x346   :  { %2401 = vmatpush1.bf16.msra.mxu0 %v4021_v43  ;;  %v4113_v43 = vld [vmem:[#allocation7 + $0x284] ss:$16 sps:$4 sm:$0xff]  }
 0x347   :  { %2483 = vmatpush1.bf16.msra.mxu1 %v4024_v44  ;;  %2402 = vmatprep.subr.bf16.mxu0 %v4029_v45  ;;  %v4116_v44 = vld [vmem:[#allocation7 + $0x28c] ss:$16 sps:$4 sm:$0xff]   ;;  %v4111_v45 = vld [vmem:[#allocation7 + $0x280] ss:$16 sps:$4 sm:$0xff]  }
 0x348   :  { %2484 = vmatprep.subr.bf16.mxu1 %v4032_v46  ;;  %v4114_v46 = vld [vmem:[#allocation7 + $0x288] ss:$16 sps:$4 sm:$0xff]  }
 0x34a   :  { %2403 = vmatpush1.bf16.msra.mxu0 %v4027_v47  ;;  %v4119_v47 = vld [vmem:[#allocation7 + $0x2a4] ss:$16 sps:$4 sm:$0xff]  }
 0x34b   :  { %2485 = vmatpush1.bf16.msra.mxu1 %v4030_v48  ;;  %2404 = vmatprep.subr.bf16.mxu0 %v4035_v49  ;;  %v4122_v48 = vld [vmem:[#allocation7 + $0x2ac] ss:$16 sps:$4 sm:$0xff]   ;;  %v4117_v49 = vld [vmem:[#allocation7 + $0x2a0] ss:$16 sps:$4 sm:$0xff]  }
 0x34c   :  { %2486 = vmatprep.subr.bf16.mxu1 %v4038_v50  ;;  %v4120_v50 = vld [vmem:[#allocation7 + $0x2a8] ss:$16 sps:$4 sm:$0xff]  }
 0x34e   :  { %2405 = vmatpush1.bf16.msra.mxu0 %v4033_v51  ;;  %v4125_v51 = vld [vmem:[#allocation7 + $0x2c4] ss:$16 sps:$4 sm:$0xff]  }
 0x34f   :  { %2487 = vmatpush1.bf16.msra.mxu1 %v4036_v52  ;;  %2406 = vmatprep.subr.bf16.mxu0 %v4041_v53  ;;  %v4128_v52 = vld [vmem:[#allocation7 + $0x2cc] ss:$16 sps:$4 sm:$0xff]   ;;  %v4123_v53 = vld [vmem:[#allocation7 + $0x2c0] ss:$16 sps:$4 sm:$0xff]  }
 0x350   :  { %2488 = vmatprep.subr.bf16.mxu1 %v4044_v54  ;;  %v4126_v54 = vld [vmem:[#allocation7 + $0x2c8] ss:$16 sps:$4 sm:$0xff]  }
 0x352   :  { %2407 = vmatpush1.bf16.msra.mxu0 %v4039_v55  ;;  %v4131_v55 = vld [vmem:[#allocation7 + $0x2e4] ss:$16 sps:$4 sm:$0xff]  }
 0x353   :  { %2489 = vmatpush1.bf16.msra.mxu1 %v4042_v56  ;;  %2408 = vmatprep.subr.bf16.mxu0 %v4047_v57  ;;  %v4134_v56 = vld [vmem:[#allocation7 + $0x2ec] ss:$16 sps:$4 sm:$0xff]   ;;  %v4129_v57 = vld [vmem:[#allocation7 + $0x2e0] ss:$16 sps:$4 sm:$0xff]  }
 0x354   :  { %2490 = vmatprep.subr.bf16.mxu1 %v4050_v58  ;;  %v4132_v58 = vld [vmem:[#allocation7 + $0x2e8] ss:$16 sps:$4 sm:$0xff]  }
 0x356   :  { %2409 = vmatpush1.bf16.msra.mxu0 %v4045_v59  ;;  %v4137_v59 = vld [vmem:[#allocation7 + $0x304] ss:$16 sps:$4 sm:$0xff]  }
 0x357   :  { %2491 = vmatpush1.bf16.msra.mxu1 %v4048_v60  ;;  %2410 = vmatprep.subr.bf16.mxu0 %v4053_v61  ;;  %v4140_v60 = vld [vmem:[#allocation7 + $0x30c] ss:$16 sps:$4 sm:$0xff]   ;;  %v4135_v61 = vld [vmem:[#allocation7 + $0x300] ss:$16 sps:$4 sm:$0xff]  }
 0x358   :  { %2492 = vmatprep.subr.bf16.mxu1 %v4056_v62  ;;  %v4138_v62 = vld [vmem:[#allocation7 + $0x308] ss:$16 sps:$4 sm:$0xff]  }
 0x35a   :  { %2411 = vmatpush1.bf16.msra.mxu0 %v4051_v63  ;;  %v4143_v63 = vld [vmem:[#allocation7 + $0x324] ss:$16 sps:$4 sm:$0xff]  }
 0x35b   :  { %2493 = vmatpush1.bf16.msra.mxu1 %v4054_v0  ;;  %2412 = vmatprep.subr.bf16.mxu0 %v4059_v1  ;;  %v4146_v0 = vld [vmem:[#allocation7 + $0x32c] ss:$16 sps:$4 sm:$0xff]   ;;  %v4141_v1 = vld [vmem:[#allocation7 + $0x320] ss:$16 sps:$4 sm:$0xff]  }
 0x35c   :  { %2494 = vmatprep.subr.bf16.mxu1 %v4062_v2  ;;  %v4144_v2 = vld [vmem:[#allocation7 + $0x328] ss:$16 sps:$4 sm:$0xff]  }
 0x35e   :  { %2413 = vmatpush1.bf16.msra.mxu0 %v4057_v3  ;;  %v4149_v3 = vld [vmem:[#allocation7 + $0x344] ss:$16 sps:$4 sm:$0xff]  }
 0x35f   :  { %2495 = vmatpush1.bf16.msra.mxu1 %v4060_v4  ;;  %2414 = vmatprep.subr.bf16.mxu0 %v4065_v9  ;;  %v4152_v4 = vld [vmem:[#allocation7 + $0x34c] ss:$16 sps:$4 sm:$0xff]   ;;  %v4147_v9 = vld [vmem:[#allocation7 + $0x340] ss:$16 sps:$4 sm:$0xff]  }
 0x360   :  { %2496 = vmatprep.subr.bf16.mxu1 %v4068_v15  ;;  %v4150_v15 = vld [vmem:[#allocation7 + $0x348] ss:$16 sps:$4 sm:$0xff]  }
 0x362   :  { %2415 = vmatpush1.bf16.msra.mxu0 %v4063_v10  ;;  %v4155_v10 = vld [vmem:[#allocation7 + $0x364] ss:$16 sps:$4 sm:$0xff]  }
 0x363   :  { %2497 = vmatpush1.bf16.msra.mxu1 %v4066_v11  ;;  %2416 = vmatprep.subr.bf16.mxu0 %v4071_v12  ;;  %v4158_v11 = vld [vmem:[#allocation7 + $0x36c] ss:$16 sps:$4 sm:$0xff]   ;;  %v4153_v12 = vld [vmem:[#allocation7 + $0x360] ss:$16 sps:$4 sm:$0xff]  }
 0x364   :  { %2498 = vmatprep.subr.bf16.mxu1 %v4074_v17  ;;  %v4156_v17 = vld [vmem:[#allocation7 + $0x368] ss:$16 sps:$4 sm:$0xff]  }
 0x366   :  { %2417 = vmatpush1.bf16.msra.mxu0 %v4069_v16  ;;  %v4161_v16 = vld [vmem:[#allocation7 + $0x384] ss:$16 sps:$4 sm:$0xff]  }
 0x367   :  { %2499 = vmatpush1.bf16.msra.mxu1 %v4072_v18  ;;  %2418 = vmatprep.subr.bf16.mxu0 %v4077_v20  ;;  %v4164_v18 = vld [vmem:[#allocation7 + $0x38c] ss:$16 sps:$4 sm:$0xff]   ;;  %v4159_v20 = vld [vmem:[#allocation7 + $0x380] ss:$16 sps:$4 sm:$0xff]  }
 0x368   :  { %2500 = vmatprep.subr.bf16.mxu1 %v4080_v21  ;;  %v4162_v21 = vld [vmem:[#allocation7 + $0x388] ss:$16 sps:$4 sm:$0xff]  }
 0x36a   :  { %2419 = vmatpush1.bf16.msra.mxu0 %v4075_v22  ;;  %v4167_v22 = vld [vmem:[#allocation7 + $0x3a4] ss:$16 sps:$4 sm:$0xff]  }
 0x36b   :  { %2501 = vmatpush1.bf16.msra.mxu1 %v4078_v26  ;;  %2420 = vmatprep.subr.bf16.mxu0 %v4083_v23  ;;  %v4170_v26 = vld [vmem:[#allocation7 + $0x3ac] ss:$16 sps:$4 sm:$0xff]   ;;  %v4165_v23 = vld [vmem:[#allocation7 + $0x3a0] ss:$16 sps:$4 sm:$0xff]  }
 0x36c   :  { %2502 = vmatprep.subr.bf16.mxu1 %v4086_v24  ;;  %v4168_v24 = vld [vmem:[#allocation7 + $0x3a8] ss:$16 sps:$4 sm:$0xff]  }
 0x36e   :  { %2421 = vmatpush1.bf16.msra.mxu0 %v4081_v25  ;;  %v4173_v25 = vld [vmem:[#allocation7 + $0x3c4] ss:$16 sps:$4 sm:$0xff]  }
 0x36f   :  { %2503 = vmatpush1.bf16.msra.mxu1 %v4084_v27  ;;  %2431 = vmatprep.subr.bf16.mxu0 %v4089_v28  ;;  %v4176_v27 = vld [vmem:[#allocation7 + $0x3cc] ss:$16 sps:$4 sm:$0xff]   ;;  %v4171_v28 = vld [vmem:[#allocation7 + $0x3c0] ss:$16 sps:$4 sm:$0xff]  }
 0x370   :  { %2513 = vmatprep.subr.bf16.mxu1 %v4092_v29  ;;  %v4174_v29 = vld [vmem:[#allocation7 + $0x3c8] ss:$16 sps:$4 sm:$0xff]  }
 0x371   :  { %2423 = vmatmul.mubr.bf16.vlgmr.msra.gmra.mrb[16].mxu0 %v621_v31 }
 0x372   :  { %2505 = vmatmul.mubr.bf16.vlgmr.msra.gmra.mrb[16].mxu1 %v621_v31  ;;  %2432 = vmatpush1.bf16.msra.mxu0 %v4087_v30  ;;  %v4179_v30 = vld [vmem:[#allocation7 + $0x3e4] ss:$16 sps:$4 sm:$0xff]   ;;  %v4182_v31 = vld [vmem:[#allocation7 + $0x3ec] ss:$16 sps:$4 sm:$0xff]  }
 0x373   :  { %2463 = vmatprep.mubr.bf16.mxu0 %v624_v13  ;;  %2514 = vmatpush1.bf16.msra.mxu1 %v4090_v32  ;;  %v4177_v32 = vld [vmem:[#allocation7 + $0x3e0] ss:$16 sps:$4 sm:$0xff]  }
 0x374   :  { %2545 = vmatprep.mubr.bf16.mxu1 %v624_v13  ;;  %2433 = vmatprep.subr.bf16.mxu0 %v4095_v33  ;;  %v4180_v33 = vld [vmem:[#allocation7 + $0x3e8] ss:$16 sps:$4 sm:$0xff]   ;;  %v4183_v13 = vld [vmem:[#allocation10 + $0x40] sm:$0xff]  }
 0x375   :  { %2515 = vmatprep.subr.bf16.mxu1 %v4098_v34  ;;  %v4184_v34 = vld [vmem:[#allocation10 + $0xc0] sm:$0xff]  }
 0x376   :  { %2434 = vmatpush1.bf16.msra.mxu0 %v4093_v35  ;;  %v4185_v35 = vld [vmem:[#allocation10] sm:$0xff]  }
 0x377   :  { %2516 = vmatpush1.bf16.msra.mxu1 %v4096_v36  ;;  %2435 = vmatprep.subr.bf16.mxu0 %v4101_v37  ;;  %v623_v36 = vmax.bf16 %v4400_v6, %v4587_v8  ;;  %v4186_v37 = vld [vmem:[#allocation10 + $0x80] sm:$0xff]   ;;  %v4194_v8 = vld [vmem:[#allocation10 + $0x90] sm:$0xff]  }
 0x378   :  { %2517 = vmatprep.subr.bf16.mxu1 %v4104_v5  ;;  %v4187_v5 = vld [vmem:[#allocation10 + $0x48] sm:$0xff]  }
 0x37a   :  { %2436 = vmatpush1.bf16.msra.mxu0 %v4099_v38  ;;  %v4188_v38 = vld [vmem:[#allocation10 + $0xc8] sm:$0xff]  }
 0x37b   :  { %2518 = vmatpush1.bf16.msra.mxu1 %v4102_v39  ;;  %2437 = vmatprep.subr.bf16.mxu0 %v4107_v40  ;;  %v4189_v39 = vld [vmem:[#allocation10 + $0x8] sm:$0xff]  }
 0x37c   :  { %2519 = vmatprep.subr.bf16.mxu1 %v4110_v14  ;;  %v4190_v40 = vld [vmem:[#allocation10 + $0x88] sm:$0xff]   ;;  %v4191_v14 = vld [vmem:[#allocation10 + $0x50] sm:$0xff]  }
 0x37e   :  { %2438 = vmatpush1.bf16.msra.mxu0 %v4105_v41  ;;  %v4192_v41 = vld [vmem:[#allocation10 + $0xd0] sm:$0xff]  }
 0x37f   :  { %2520 = vmatpush1.bf16.msra.mxu1 %v4108_v42  ;;  %2439 = vmatprep.subr.bf16.mxu0 %v4113_v43  ;;  %v4193_v42 = vld [vmem:[#allocation10 + $0x10] sm:$0xff]   ;;  %v4195_v43 = vld [vmem:[#allocation10 + $0x58] sm:$0xff]  }
 0x380   :  { %2521 = vmatprep.subr.bf16.mxu1 %v4116_v44  ;;  %v4196_v44 = vld [vmem:[#allocation10 + $0xd8] sm:$0xff]  }
 0x382   :  { %2440 = vmatpush1.bf16.msra.mxu0 %v4111_v45  ;;  %v4197_v45 = vld [vmem:[#allocation10 + $0x18] sm:$0xff]  }
 0x383   :  { %2522 = vmatpush1.bf16.msra.mxu1 %v4114_v46  ;;  %2441 = vmatprep.subr.bf16.mxu0 %v4119_v47  ;;  %v4198_v46 = vld [vmem:[#allocation10 + $0x98] sm:$0xff]   ;;  %v4199_v47 = vld [vmem:[#allocation10 + $0x60] sm:$0xff]  }
 0x384   :  { %2523 = vmatprep.subr.bf16.mxu1 %v4122_v48  ;;  %v4200_v48 = vld [vmem:[#allocation10 + $0xe0] sm:$0xff]  }
 0x386   :  { %2442 = vmatpush1.bf16.msra.mxu0 %v4117_v49  ;;  %v4201_v49 = vld [vmem:[#allocation10 + $0x20] sm:$0xff]  }
 0x387   :  { %2524 = vmatpush1.bf16.msra.mxu1 %v4120_v50  ;;  %2443 = vmatprep.subr.bf16.mxu0 %v4125_v51  ;;  %v4202_v50 = vld [vmem:[#allocation10 + $0xa0] sm:$0xff]   ;;  %v4203_v51 = vld [vmem:[#allocation10 + $0x68] sm:$0xff]  }
 0x388   :  { %2525 = vmatprep.subr.bf16.mxu1 %v4128_v52  ;;  %v4204_v52 = vld [vmem:[#allocation10 + $0xe8] sm:$0xff]  }
 0x38a   :  { %2444 = vmatpush1.bf16.msra.mxu0 %v4123_v53  ;;  %v4205_v53 = vld [vmem:[#allocation10 + $0x28] sm:$0xff]  }
 0x38b   :  { %2526 = vmatpush1.bf16.msra.mxu1 %v4126_v54  ;;  %2445 = vmatprep.subr.bf16.mxu0 %v4131_v55  ;;  %v4206_v54 = vld [vmem:[#allocation10 + $0xa8] sm:$0xff]  }
 0x38c   :  { %2527 = vmatprep.subr.bf16.mxu1 %v4134_v56 }
 0x38e   :  { %2446 = vmatpush1.bf16.msra.mxu0 %v4129_v57  ;;  %v4207_v57 = vld [vmem:[#allocation10 + $0x70] sm:$0xff]  }
 0x38f   :  { %2528 = vmatpush1.bf16.msra.mxu1 %v4132_v58  ;;  %2447 = vmatprep.subr.bf16.mxu0 %v4137_v59  ;;  %v4208_v58 = vld [vmem:[#allocation10 + $0xf0] sm:$0xff]  }
 0x390   :  { %2529 = vmatprep.subr.bf16.mxu1 %v4140_v60 }
 0x392   :  { %2448 = vmatpush1.bf16.msra.mxu0 %v4135_v61  ;;  %v4209_v61 = vld [vmem:[#allocation10 + $0x30] sm:$0xff]  }
 0x393   :  { %2530 = vmatpush1.bf16.msra.mxu1 %v4138_v62  ;;  %2449 = vmatprep.subr.bf16.mxu0 %v4143_v63  ;;  %v4210_v62 = vld [vmem:[#allocation10 + $0xb0] sm:$0xff]  }
 0x394   :  { %2531 = vmatprep.subr.bf16.mxu1 %v4146_v0 }
 0x396   :  { %2450 = vmatpush1.bf16.msra.mxu0 %v4141_v1 }
 0x397   :  { %2532 = vmatpush1.bf16.msra.mxu1 %v4144_v2  ;;  %2451 = vmatprep.subr.bf16.mxu0 %v4149_v3  ;;  %v4211_v3 = vld [vmem:[#allocation10 + $0x78] sm:$0xff]  }
 0x398   :  { %2533 = vmatprep.subr.bf16.mxu1 %v4152_v4  ;;  %v4212_v4 = vld [vmem:[#allocation10 + $0xf8] sm:$0xff]  }
 0x39a   :  { %2452 = vmatpush1.bf16.msra.mxu0 %v4147_v9  ;;  %v4213_v9 = vld [vmem:[#allocation10 + $0x38] sm:$0xff]  }
 0x39b   :  { %2534 = vmatpush1.bf16.msra.mxu1 %v4150_v15  ;;  %2453 = vmatprep.subr.bf16.mxu0 %v4155_v10  ;;  %v4214_v15 = vld [vmem:[#allocation10 + $0xb8] sm:$0xff]   ;;  %v4215_v10 = vld [vmem:[#allocation8 + $0x40] sm:$0xff]  }
 0x39c   :  { %2535 = vmatprep.subr.bf16.mxu1 %v4158_v11  ;;  %v4216_v11 = vld [vmem:[#allocation8 + $0xc0] sm:$0xff]  }
 0x39e   :  { %2454 = vmatpush1.bf16.msra.mxu0 %v4153_v12  ;;  %v3596_v12 = vld.sshfl [vmem:[%s4678_s8 + $0xe] sm:$0x33 pattern:$0x75316420] }
 0x39f   :  { %2536 = vmatpush1.bf16.msra.mxu1 %v4156_v17  ;;  %2455 = vmatprep.subr.bf16.mxu0 %v4161_v16  ;;  %v4621_v17 = vld.sshfl [vmem:[%s4678_s8 + $0xa] sm:$0x33 pattern:$0x75316420]  ;;  %v2566_v16 = vcombine.high %v3596_v12, %v3596_v12 }
 0x3a0   :  { %2537 = vmatprep.subr.bf16.mxu1 %v4164_v18  ;;  %v1569_v18 = vcombine.high %v4621_v17, %v4621_v17 }
 0x3a2   :  { %2456 = vmatpush1.bf16.msra.mxu0 %v4159_v20  ;;  %v2573_v20 = vrot.slane %v3596_v12, %v4558_v7  ;;  %v4228_v12 = vld [vmem:[#allocation8 + $0xd8] sm:$0xff]  }
 0x3a3   :  { %2538 = vmatpush1.bf16.msra.mxu1 %v4162_v21  ;;  %2457 = vmatprep.subr.bf16.mxu0 %v4167_v22  ;;  %v2580_v21 = vrot.slane %v2566_v16, %v4558_v7  ;;  %v1583_v22 = vrot.slane %v1569_v18, %v4558_v7  ;;  %v4229_v16 = vld [vmem:[#allocation8 + $0x18] sm:$0xff]  }
 0x3a4   :  { %2539 = vmatprep.subr.bf16.mxu1 %v4170_v26  ;;  %v2581_v26 = vcombine.high %v2573_v20, %v2573_v20  ;;  %v4230_v18 = vld [vmem:[#allocation8 + $0x98] sm:$0xff]  }
 0x3a6   :  { %2458 = vmatpush1.bf16.msra.mxu0 %v4165_v23  ;;  %v2582_v23 = vcombine.high %v2580_v21, %v2580_v21 }
 0x3a7   :  { %2540 = vmatpush1.bf16.msra.mxu1 %v4168_v24  ;;  %2459 = vmatprep.subr.bf16.mxu0 %v4173_v25  ;;  %v1585_v24 = vcombine.high %v1583_v22, %v1583_v22  ;;  %v2584_v25 = vpack.i.b16 %v2573_v20, %v2573_v20  ;;  %v4231_v20 = vld [vmem:[#allocation8 + $0x60] sm:$0xff]  }
 0x3a8   :  { %2541 = vmatprep.subr.bf16.mxu1 %v4176_v27  ;;  %v2598_v27 = vpack.i.b16 %v2581_v26, %v2581_v26  ;;  %v4233_v26 = vld [vmem:[#allocation8 + $0x20] sm:$0xff]  }
 0x3aa   :  { %2460 = vmatpush1.bf16.msra.mxu0 %v4171_v28  ;;  %v2591_v28 = vpack.i.b16 %v2580_v21, %v2580_v21  ;;  %v1576_v21 = vrot.slane %v4621_v17, %v4558_v7  ;;  %v4240_v7 = vld [vmem:[#allocation8 + $0xf0] sm:$0xff]  }
 0x3ab   :  { %2542 = vmatpush1.bf16.msra.mxu1 %v4174_v29  ;;  %2461 = vmatprep.subr.bf16.mxu0 %v4179_v30  ;;  %v1594_v29 = vpack.i.b16 %v1583_v22, %v1583_v22  ;;  %v2605_v30 = vpack.i.b16 %v2582_v23, %v2582_v23  ;;  %v4232_v22 = vld [vmem:[#allocation8 + $0xe0] sm:$0xff]   ;;  %v4241_v17 = vld [vmem:[#allocation8 + $0x30] sm:$0xff]  }
 0x3ac   :  { %2543 = vmatprep.subr.bf16.mxu1 %v4182_v31  ;;  %v1608_v31 = vpack.i.b16 %v1585_v24, %v1585_v24  ;;  %v4234_v23 = vld [vmem:[#allocation8 + $0xa0] sm:$0xff]   ;;  %v4235_v24 = vld [vmem:[#allocation8 + $0x68] sm:$0xff]  }
 0x3ae   :  { %2462 = vmatpush1.bf16.msra.mxu0 %v4177_v32  ;;  %v2589_v32 = vrot.slane %v2584_v25, %v4541_v19  ;;  %v1584_v25 = vcombine.high %v1576_v21, %v1576_v21 }
 0x3af   :  { %2544 = vmatpush1.bf16.msra.mxu1 %v4180_v33  ;;  %3665 = vmatprep.subr.bf16.mxu0 %v4183_v13  ;;  %v2603_v13 = vrot.slane %v2598_v27, %v4541_v19  ;;  %v4236_v27 = vld [vmem:[#allocation8 + $0xe8] sm:$0xff]  }
 0x3b0   :  { %3687 = vmatprep.subr.bf16.mxu1 %v4184_v34  ;;  %v2596_v34 = vrot.slane %v2591_v28, %v4541_v19  ;;  %v4237_v28 = vld [vmem:[#allocation8 + $0x28] sm:$0xff]  }
 0x3b1   :  { %2464 = vmatmul.mubr.bf16.vlgmr.msra.gmra.mrb[16].mxu0 %v623_v36 }
 0x3b2   :  { %2546 = vmatmul.mubr.bf16.vlgmr.msra.gmra.mrb[16].mxu1 %v623_v36  ;;  %3666 = vmatpush3.bf16.msra.mxu0 %v4185_v35  ;;  %v1599_v36 = vrot.slane %v1594_v29, %v4541_v19  ;;  %v1587_v29 = vpack.i.b16 %v1576_v21, %v1576_v21 }
 0x3b3   :  { %3688 = vmatpush3.bf16.msra.mxu1 %v4186_v37  ;;  %3667 = vmatprep.subr.bf16.mxu0 %v4187_v5 }
 0x3b4   :  { %3689 = vmatprep.subr.bf16.mxu1 %v4188_v38 }
 0x3b6   :  { %3668 = vmatpush3.bf16.msra.mxu0 %v4189_v39  ;;  %v2610_v39 = vrot.slane %v2605_v30, %v4541_v19  ;;  %v4238_v30 = vld [vmem:[#allocation8 + $0xa8] sm:$0xff]  }
 0x3b7   :  { %3690 = vmatpush3.bf16.msra.mxu1 %v4190_v40  ;;  %3669 = vmatprep.subr.bf16.mxu0 %v4191_v14  ;;  %v1613_v14 = vrot.slane %v1608_v31, %v4541_v19  ;;  %v4239_v31 = vld [vmem:[#allocation8 + $0x70] sm:$0xff]  }
 0x3b8   :  { %3691 = vmatprep.subr.bf16.mxu1 %v4192_v41 }
 0x3ba   :  { %3670 = vmatpush3.bf16.msra.mxu0 %v4193_v42 }
 0x3bb   :  { %3692 = vmatpush3.bf16.msra.mxu1 %v4194_v8  ;;  %3671 = vmatprep.subr.bf16.mxu0 %v4195_v43 }
 0x3bc   :  { %3693 = vmatprep.subr.bf16.mxu1 %v4196_v44 }
 0x3be   :  { %3672 = vmatpush3.bf16.msra.mxu0 %v4197_v45 }
 0x3bf   :  { %3694 = vmatpush3.bf16.msra.mxu1 %v4198_v46  ;;  %3673 = vmatprep.subr.bf16.mxu0 %v4199_v47 }
 0x3c0   :  { %3695 = vmatprep.subr.bf16.mxu1 %v4200_v48 }
 0x3c2   :  { %3674 = vmatpush3.bf16.msra.mxu0 %v4201_v49 }
 0x3c3   :  { %3696 = vmatpush3.bf16.msra.mxu1 %v4202_v50  ;;  %3675 = vmatprep.subr.bf16.mxu0 %v4203_v51 }
 0x3c4   :  { %3697 = vmatprep.subr.bf16.mxu1 %v4204_v52 }
 0x3c6   :  { %3676 = vmatpush3.bf16.msra.mxu0 %v4205_v53 }
 0x3c7   :  { %3698 = vmatpush3.bf16.msra.mxu1 %v4206_v54  ;;  %3677 = vmatprep.subr.bf16.mxu0 %v4207_v57  ;;  %v4217_v57 = vld [vmem:[#allocation8] sm:$0xff]  }
 0x3c8   :  { %3699 = vmatprep.subr.bf16.mxu1 %v4208_v58 }
 0x3ca   :  { %3678 = vmatpush3.bf16.msra.mxu0 %v4209_v61 }
 0x3cb   :  { %3700 = vmatpush3.bf16.msra.mxu1 %v4210_v62  ;;  %3679 = vmatprep.subr.bf16.mxu0 %v4211_v3  ;;  %v4219_v62 = vld [vmem:[#allocation8 + $0x48] sm:$0xff]  }
 0x3cc   :  { %3701 = vmatprep.subr.bf16.mxu1 %v4212_v4  ;;  %v4222_v3 = vld [vmem:[#allocation8 + $0x88] sm:$0xff]   ;;  %v4223_v4 = vld [vmem:[#allocation8 + $0x50] sm:$0xff]  }
 0x3ce   :  { %3680 = vmatpush3.bf16.msra.mxu0 %v4213_v9  ;;  %v4224_v9 = vld [vmem:[#allocation8 + $0xd0] sm:$0xff]  }
 0x3cf   :  { %3702 = vmatpush3.bf16.msra.mxu1 %v4214_v15  ;;  %3709 = vmatprep.subr.bf16.mxu0 %v4215_v10  ;;  %v4225_v15 = vld [vmem:[#allocation8 + $0x10] sm:$0xff]  }
 0x3d0   :  { %3731 = vmatprep.subr.bf16.mxu1 %v4216_v11  ;;  %v4226_v10 = vld [vmem:[#allocation8 + $0x90] sm:$0xff]   ;;  %v4227_v11 = vld [vmem:[#allocation8 + $0x58] sm:$0xff]  }
 0x404   :  { %v4607_v55 = vpop.f32.mrb[12].mxu0  ;;  %v4609_v56 = vpop.f32.mrb[12].mxu1 }
 0x405   :  { %v4611_v59 = vpop.f32.mrb[13].mxu0  ;;  %v4613_v60 = vpop.f32.mrb[13].mxu1 }
 0x406   :  { %v1472_v63 = vpop.f32.mrb[14].mxu0  ;;  %v1554_v0 = vpop.f32.mrb[14].mxu1  ;;  %v1558_v35 = vpack.c.bf16 %v4611_v59, %v4611_v59  ;;  %v1560_v40 = vpack.c.bf16 %v4613_v60, %v4613_v60  ;;  %v4218_v60 = vld [vmem:[#allocation8 + $0x80] sm:$0xff]  }
 0x407   :  { %v1473_v1 = vpop.f32.mrb[15].mxu0  ;;  %v1555_v2 = vpop.f32.mrb[15].mxu1  ;;  %v4220_v0 = vld [vmem:[#allocation8 + $0xc8] sm:$0xff]  }
 0x408   :  { %v1615_v51 = vadd.bf16 %v1599_v36, %v1558_v35  ;;  %v1617_v53 = vadd.bf16 %v1613_v14, %v1560_v40  ;;  %v4221_v2 = vld [vmem:[#allocation8 + $0x8] sm:$0xff]   ;;  %v4243_v35 = vld [vmem:[#allocation8 + $0x78] sm:$0xff]   ;;  %v1559_v36 = vpack.c.bf16 %v4609_v56, %v4609_v56 }
 0x409   :  { %v4246_v40 = vld [vmem:[#allocation8 + $0xb8] sm:$0xff]  }
 0x40a   :  { %v1619_v63 = vmax.bf16 %v4400_v6, %v1615_v51  ;;  %v1621_v1 = vmax.bf16 %v4400_v6, %v1617_v53  ;;  %v107_v51 = vld [vmem:[%s4678_s8 + $0x12] sm:$0x1]  ;;  %s4357_s8 = scalar_lea.vmem %s3306_s26, 64 }
 0x40b   :  { %v3291_v53 = vunpack.c.l.bf16 %v107_v51  ;;  %p4358_p12 = scmp.ne.s32.totalorder %s3306_s26, %s4357_s8  ;;  %p4363_p0 = scmp.lt.s32.totalorder %s4357_s8, %s4357_s8 }
 0x40d   :  { %p4364_p1 = por %p4363_p0, %p4362_p13 }
 0x40f   :  { %p4365_p2 = pnand %p4364_p1, %p4358_p12 }
 0x484   :  { %v2465_v33 = vpop.f32.mrb[16].mxu0 }
 0x485   :  { %v2554_v37 = vpack.c.bf16 %v2465_v33, %v2465_v33  ;;  %v2547_v5 = vpop.f32.mrb[16].mxu1  ;;  %v2467_v38 = vpop.f32.mrb[17].mxu0  ;;  %v1557_v33 = vpack.c.bf16 %v4607_v55, %v4607_v55 }
 0x486   :  { %v2556_v41 = vpack.c.bf16 %v2547_v5, %v2547_v5  ;;  %v2555_v42 = vpack.c.bf16 %v2467_v38, %v2467_v38  ;;  %v2549_v8 = vpop.f32.mrb[17].mxu1  ;;  %v2469_v43 = vpop.f32.mrb[18].mxu0  ;;  %v4244_v5 = vld [vmem:[#allocation8 + $0xf8] sm:$0xff]  }
 0x487   :  { %v2611_v44 = vadd.bf16 %v2589_v32, %v2554_v37  ;;  %v2557_v45 = vpack.c.bf16 %v2549_v8, %v2549_v8  ;;  %v2551_v46 = vpop.f32.mrb[18].mxu1  ;;  %v2470_v47 = vpop.f32.mrb[19].mxu0  ;;  %v1601_v32 = vpack.i.b16 %v1584_v25, %v1584_v25  ;;  %v4245_v38 = vld [vmem:[#allocation8 + $0x38] sm:$0xff]  }
 0x488   :  { %v2613_v48 = vadd.bf16 %v2603_v13, %v2556_v41  ;;  %v2612_v49 = vadd.bf16 %v2596_v34, %v2555_v42  ;;  %v2552_v50 = vpop.f32.mrb[19].mxu1  ;;  %v1592_v13 = vrot.slane %v1587_v29, %v4541_v19  ;;  %v4242_v34 = vld [vmem:[#allocation8 + $0xb0] sm:$0xff]  }
 0x489   :  { %v2614_v52 = vadd.bf16 %v2610_v39, %v2557_v45  ;;  %v2615_v58 = vmax.bf16 %v4400_v6, %v2611_v44  ;;  %v1606_v37 = vrot.slane %v1601_v32, %v4541_v19 }
 0x48a   :  { %v2616_v54 = vmax.bf16 %v4400_v6, %v2612_v49  ;;  %v2617_v61 = vmax.bf16 %v4400_v6, %v2613_v48  ;;  %v1614_v39 = vadd.bf16 %v1592_v13, %v1557_v33 }
 0x48b   :  { %v2618_v59 = vmax.bf16 %v4400_v6, %v2614_v52  ;;  %v1616_v55 = vadd.bf16 %v1606_v37, %v1559_v36 }
 0x48c   :  { %2971 = vmatprep.mubr.bf16.mxu0 %v2616_v54  ;;  %v1618_v14 = vmax.bf16 %v4400_v6, %v1614_v39 }
 0x48d   :  { %3011 = vmatprep.mubr.bf16.mxu1 %v2618_v59  ;;  %2972 = vmatmul.mubr.bf16.vlgmr.msra.gmra.mrb[20].mxu0 %v2615_v58  ;;  %v1620_v41 = vmax.bf16 %v4400_v6, %v1616_v55 }
 0x48e   :  { %3012 = vmatmul.mubr.bf16.vlgmr.msra.gmra.mrb[20].mxu1 %v2617_v61  ;;  %3710 = vmatpush3.bf16.msra.mxu0 %v4217_v57 }
 0x48f   :  { %3732 = vmatpush3.bf16.msra.mxu1 %v4218_v60  ;;  %3243 = vmatprep.mubr.bf16.mxu0 %v1619_v63 }
 0x490   :  { %3283 = vmatprep.mubr.bf16.mxu1 %v1621_v1  ;;  %3711 = vmatprep.subr.bf16.mxu0 %v4219_v62  ;;  %v3295_v1 = vrot.slane %v3291_v53, %v4541_v19 }
 0x491   :  { %3733 = vmatprep.subr.bf16.mxu1 %v4220_v0 }
 0x492   :  { %3712 = vmatpush3.bf16.msra.mxu0 %v4221_v2 }
 0x493   :  { %3734 = vmatpush3.bf16.msra.mxu1 %v4222_v3  ;;  %3713 = vmatprep.subr.bf16.mxu0 %v4223_v4 }
 0x494   :  { %3735 = vmatprep.subr.bf16.mxu1 %v4224_v9 }
 0x496   :  { %3714 = vmatpush3.bf16.msra.mxu0 %v4225_v15 }
 0x497   :  { %3736 = vmatpush3.bf16.msra.mxu1 %v4226_v10  ;;  %3715 = vmatprep.subr.bf16.mxu0 %v4227_v11 }
 0x498   :  { %3737 = vmatprep.subr.bf16.mxu1 %v4228_v12 }
 0x49a   :  { %3716 = vmatpush3.bf16.msra.mxu0 %v4229_v16 }
 0x49b   :  { %3738 = vmatpush3.bf16.msra.mxu1 %v4230_v18  ;;  %3717 = vmatprep.subr.bf16.mxu0 %v4231_v20 }
 0x49c   :  { %3739 = vmatprep.subr.bf16.mxu1 %v4232_v22 }
 0x49e   :  { %3718 = vmatpush3.bf16.msra.mxu0 %v4233_v26 }
 0x49f   :  { %3740 = vmatpush3.bf16.msra.mxu1 %v4234_v23  ;;  %3719 = vmatprep.subr.bf16.mxu0 %v4235_v24 }
 0x4a0   :  { %3741 = vmatprep.subr.bf16.mxu1 %v4236_v27 }
 0x4a2   :  { %3720 = vmatpush3.bf16.msra.mxu0 %v4237_v28 }
 0x4a3   :  { %3742 = vmatpush3.bf16.msra.mxu1 %v4238_v30  ;;  %3721 = vmatprep.subr.bf16.mxu0 %v4239_v31 }
 0x4a4   :  { %3743 = vmatprep.subr.bf16.mxu1 %v4240_v7 }
 0x4a6   :  { %3722 = vmatpush3.bf16.msra.mxu0 %v4241_v17 }
 0x4a7   :  { %3744 = vmatpush3.bf16.msra.mxu1 %v4242_v34  ;;  %3723 = vmatprep.subr.bf16.mxu0 %v4243_v35 }
 0x4a8   :  { %3745 = vmatprep.subr.bf16.mxu1 %v4244_v5 }
 0x4aa   :  { %3724 = vmatpush3.bf16.msra.mxu0 %v4245_v38 }
 0x4ab   :  { %3746 = vmatpush3.bf16.msra.mxu1 %v4246_v40 }
 0x4ad   :  { %3244 = vmatmul.mubr.bf16.vlgmr.msra.gmra.mrb[24].mxu0 %v1618_v14 }
 0x4ae   :  { %3284 = vmatmul.mubr.bf16.vlgmr.msra.gmra.mrb[24].mxu1 %v1620_v41 }
 0x560   :  { %v3681_v56 = vpop.f32.mrb[20].mxu0 }
 0x561   :  { %v3703_v42 = vpop.f32.mrb[20].mxu1  ;;  %v3682_v8 = vpop.f32.mrb[21].mxu0 }
 0x562   :  { %v3683_v43 = vadd.f32 %v3682_v8, %v3681_v56  ;;  %v3704_v44 = vpop.f32.mrb[21].mxu1  ;;  %v3684_v45 = vpop.f32.mrb[22].mxu0 }
 0x563   :  { %v3705_v46 = vadd.f32 %v3704_v44, %v3703_v42  ;;  %v3706_v47 = vpop.f32.mrb[22].mxu1  ;;  %v3685_v48 = vpop.f32.mrb[23].mxu0 }
 0x564   :  { %v3707_v49 = vpop.f32.mrb[23].mxu1 }
 0x565   :  { %v3014_v50 = vadd.f32 %v3705_v46, %v3683_v43 }
 0x580   :  { %v3725_v52 = vpop.f32.mrb[24].mxu0 }
 0x581   :  { %v3747_v6 = vpop.f32.mrb[24].mxu1  ;;  %v3726_v54 = vpop.f32.mrb[25].mxu0 }
 0x582   :  { %v3727_v57 = vadd.f32 %v3726_v54, %v3725_v52  ;;  %v3748_v58 = vpop.f32.mrb[25].mxu1  ;;  %v3728_v59 = vpop.f32.mrb[26].mxu0 }
 0x583   :  { %v3749_v60 = vadd.f32 %v3748_v58, %v3747_v6  ;;  %v3750_v61 = vpop.f32.mrb[26].mxu1  ;;  %v3729_v62 = vpop.f32.mrb[27].mxu0 }
 0x584   :  { %v3246_v63 = vadd.f32 %v3727_v57, %v3014_v50  ;;  %v3751_v0 = vpop.f32.mrb[27].mxu1 }
 0x586   :  { %v3286_v2 = vadd.f32 %v3749_v60, %v3246_v63 }
 0x588   :  { %v3296_v3 = vadd.f32 %v3295_v1, %v3286_v2 }
 0x58a   :  { %v3297_v4 = vpack.c.bf16 %v3296_v3, %v3296_v3 }
 0x58c   :  { %3298 = vst [vmem:[#allocation11] sm:$0xf] %v3297_v4 }
 0x58d   :  { %4368 = shalt.err (!%p4365_p2)
}
 0x58e   :  { %s4369_s24 = scalar_lea.hbm %s4679_s9, 64 }
 0x58f   :  { %p4370_p3 = scmp.ne.s32.totalorder %s4679_s9, %s4369_s24  ;;  %p4373_p4 = scmp.lt.u32.totalorder %s4369_s24, %s4679_s9 }
 0x591   :  { %p4375_p5 = pnand %p4373_p4, %p4370_p3 }
 0x593   :  { %4378 = shalt.err (!%p4375_p5)
}
 0x594   :  { %3308 = dma.vmem_to_hbm [thread:$0]  %s3306_s26, 64, %s4679_s9, [#allocation4]  }
 0x595   :  { %4385 = dma.done.wait [#allocation4], 64  }
 0x596   :  { %4386 = vsyncadd [#allocation4], 4294967232 }
 0x597   :  { %3312 = vsyncpa [#allocation3], 1 }
 0x598   :  { %3313 = vsyncpa [#allocation6], 1 }
 0x599   :  { %3314 = vsyncpa [#allocation9], 1 }
 0x59a   :  { %3315 = vsyncpa [#allocation4], 1 }

</bundles_post_ra>
